<compile_context>
chip_gen: v7x
topology: tpu7x:2x2x1
jax: 0.10.0
libtpu: 0.0.40
codegen_flags: <defaults>
</compile_context>

<pallas_src>
import functools

import jax
import jax.numpy as jnp
from jax.experimental import pallas as pl
from jax.experimental.pallas import tpu as pltpu

# ---------------- problem sizes (small, synthetic) ----------------
NUM_MASHUPS = 24          # multiple of 8 (sublane aligned)
NUM_APIS = 40             # multiple of 8
NUM_NODES = NUM_MASHUPS + NUM_APIS
LATENT_DIM = 32           # args.recdim (padded to 128 lanes in the wrapper)
LANE = 128
N_LAYERS = 2              # args.layer
SSL_TEMP = 0.2            # args.ssl_temp
BATCH = 8                 # len(mashups)
NUM_VIEWS = 3             # Graph, diffGraph1, diffGraph2

_VMEM = pl.BlockSpec(memory_space=pltpu.MemorySpace.VMEM)


# ============================ fused Pallas kernel ============================

def _fused_lightgcn_kernel(
        graphs_ref, mm_ref, aa_ref, all0_ref, hm0_ref, ha0_ref,
        m_idx_ref, p_idx_ref, n_idx_ref, sm_idx_ref, sa_idx_ref,
        mask_m_ref, mask_a_ref,
        out_ref,
        *, n_layers, n_m, n_a, n_views, temp):
    """3-view LightGCN propagation + BPR + reg + both SSL losses, fused.

    graphs_ref : (V*N, N) bf16  stacked bipartite normalized adjacency
    mm_ref     : (NM, NM) bf16  mashup-mashup graph
    aa_ref     : (NA, NA) bf16  api-api graph
    all0_ref   : (N, DP)  f32   concat(embedding_mashup, embedding_api), padded
    hm0_ref    : (NM, DP) f32   embedding_mashup_mashup, padded
    ha0_ref    : (NA, DP) f32   embedding_api_api, padded
    *_idx_ref  : (B, 1)   i32   batch / sorted-unique indices
    mask_*_ref : (B, 1)   f32   first-occurrence masks (torch.unique dedup)
    out_ref    : (1, 128) f32   [loss, reg_loss, ssl_mashups, ssl_apis, 0...]
    """
    f32 = jnp.float32
    bf16 = jnp.bfloat16
    n = n_m + n_a

    graphs = graphs_ref[...]                                     # (V*N, N) bf16
    all0 = all0_ref[...]                                         # (N, DP) f32

    # Homo propagation is layer-invariant in the reference (mashup_mashup_emb /
    # api_api_emb never reassigned inside the layer loop): compute ONCE, as two
    # dense matmuls (no block-diagonal zero padding).
    homo_m = jnp.dot(mm_ref[...], hm0_ref[...].astype(bf16),
                     preferred_element_type=f32)                 # (NM, DP)
    homo_a = jnp.dot(aa_ref[...], ha0_ref[...].astype(bf16),
                     preferred_element_type=f32)                 # (NA, DP)
    homo = jnp.concatenate([homo_m, homo_a], axis=0)             # (N, DP)

    # ---- layer 1: all views share all0 -> ONE stacked matmul ----
    g1 = jnp.dot(graphs, all0.astype(bf16),
                 preferred_element_type=f32)                     # (V*N, DP)
    views, accs = [], []
    for v in range(n_views):
        e_v = 0.5 * (g1[v * n:(v + 1) * n, :] + homo)
        views.append(e_v)
        accs.append(all0 + e_v)                                  # layer-0 + layer-1

    # ---- layers 2..L: per-view explicit dots ----
    for _ in range(1, n_layers):
        for v in range(n_views):
            g_v = jnp.dot(graphs[v * n:(v + 1) * n, :], views[v].astype(bf16),
                          preferred_element_type=f32)
            e_v = 0.5 * (g_v + homo)
            views[v] = e_v
            accs[v] = accs[v] + e_v

    inv_lp1 = 1.0 / float(n_layers + 1)
    avg = [a * inv_lp1 for a in accs]       # stack(dim=1).mean(dim=1), per view

    # ---- in-kernel gathers via one-hot selection matmuls ----
    def onehot(idx, size):
        cols = jax.lax.broadcasted_iota(jnp.int32, (idx.shape[0], size), 1)
        return (cols == idx).astype(f32)    # (B, size)

    sel_m = onehot(m_idx_ref[...], n_m)
    sel_p = onehot(p_idx_ref[...], n_a)
    sel_n = onehot(n_idx_ref[...], n_a)
    sel_sm = onehot(sm_idx_ref[...], n_m)   # sorted (unique-masked) mashups
    sel_sa = onehot(sa_idx_ref[...], n_a)   # sorted (unique-masked) pos apis
    batch = float(sel_m.shape[0])

    # ---- BPR loss + L2 reg, summed over the 3 views ----
    loss = 0.0
    reg = 0.0
    for v in range(n_views):
        m_tab = avg[v][:n_m, :]
        a_tab = avg[v][n_m:, :]
        me = jnp.dot(sel_m, m_tab, preferred_element_type=f32)   # (B, DP)
        pe = jnp.dot(sel_p, a_tab, preferred_element_type=f32)
        ne = jnp.dot(sel_n, a_tab, preferred_element_type=f32)
        pos = jnp.sum(me * pe, axis=-1, keepdims=True)           # (B, 1)
        neg = jnp.sum(me * ne, axis=-1, keepdims=True)
        x = neg - pos
        softplus = jnp.maximum(x, 0.0) + jnp.log(1.0 + jnp.exp(-jnp.abs(x)))
        loss = loss + jnp.sum(softplus) / batch
        reg = reg + 0.5 * (jnp.sum(me * me) + jnp.sum(pe * pe)
                           + jnp.sum(ne * ne)) / batch

    # ---- SSL (views 1 & 2); F.normalize folded in, duplicates masked out ----
    inv_t = 1.0 / float(temp)

    def ssl(e1, e2, mask):                  # mask: (B,1) first-occurrence
        e1 = e1 * jax.lax.rsqrt(
            jnp.maximum(jnp.sum(e1 * e1, axis=-1, keepdims=True), 1e-24))
        e2 = e2 * jax.lax.rsqrt(
            jnp.maximum(jnp.sum(e2 * e2, axis=-1, keepdims=True), 1e-24))
        pos = jnp.sum(e1 * e2, axis=-1, keepdims=True) * inv_t             # (B,1)
        scores = jax.lax.dot_general(
            e1, e2, (((1,), (1,)), ((), ())),
            preferred_element_type=f32) * inv_t                            # (B,B)
        # column-masked denominator as a matmul: sum_j exp(s_ij) * mask_j
        denom = jnp.dot(jnp.exp(scores), mask, preferred_element_type=f32)  # (B,1)
        per_row = (pos - jnp.log(denom)) * mask   # log(exp(pos)/denom)
        return -jnp.sum(per_row) / jnp.sum(mask)

    m1, m2 = avg[1][:n_m, :], avg[2][:n_m, :]
    a1, a2 = avg[1][n_m:, :], avg[2][n_m:, :]
    ssl_m = ssl(jnp.dot(sel_sm, m1, preferred_element_type=f32),
                jnp.dot(sel_sm, m2, preferred_element_type=f32),
                mask_m_ref[...])
    ssl_a = ssl(jnp.dot(sel_sa, a1, preferred_element_type=f32),
                jnp.dot(sel_sa, a2, preferred_element_type=f32),
                mask_a_ref[...])

    # ---- pack the 4 scalars into one lane-dense row ----
    lane = jax.lax.broadcasted_iota(jnp.int32, (1, LANE), 1)
    out_ref[...] = (jnp.where(lane == 0, loss, 0.0)
                    + jnp.where(lane == 1, reg, 0.0)
                    + jnp.where(lane == 2, ssl_m, 0.0)
                    + jnp.where(lane == 3, ssl_a, 0.0))


# ============================ wrapper ============================

def _sorted_unique_mask(index):
    """torch.unique(index) equivalent: sorted indices + first-occurrence mask."""
    s = jnp.sort(index)
    is_first = jnp.concatenate([jnp.ones((1,), jnp.bool_), s[1:] != s[:-1]])
    return s, is_first.astype(jnp.float32)


@jax.jit
def lightgcn_forward(params, graphs, mashups, pos_apis, neg_apis):
    """Mirrors LightGCN.forward(mashups, pos_apis, neg_apis, diffGraph, diffGraph1)."""
    emb_m, emb_a, emb_mm, emb_aa = params
    graph, mm_graph, aa_graph, diff_graph1, diff_graph2 = graphs

    n_m, d = emb_m.shape
    n_a = emb_a.shape[0]
    dp = ((d + LANE - 1) // LANE) * LANE          # lane-dense latent dim

    def pad_d(x):
        return jnp.pad(x, ((0, 0), (0, dp - d)))  # zero pad -> results unchanged

    all0 = pad_d(jnp.concatenate([emb_m, emb_a], axis=0))        # (N, DP)  f32
    hm0 = pad_d(emb_mm)                                          # (NM, DP) f32
    ha0 = pad_d(emb_aa)                                          # (NA, DP) f32

    # stacked bipartite graphs for the 3 views; bf16 matmul operands
    graphs_flat = jnp.concatenate(
        [graph, diff_graph1, diff_graph2], axis=0).astype(jnp.bfloat16)  # (3N, N)
    mm_bf = mm_graph.astype(jnp.bfloat16)
    aa_bf = aa_graph.astype(jnp.bfloat16)

    b = mashups.shape[0]
    sm, mask_m = _sorted_unique_mask(mashups)
    sa, mask_a = _sorted_unique_mask(pos_apis)

    col_i32 = lambda x: x.astype(jnp.int32).reshape(b, 1)
    col_f32 = lambda x: x.astype(jnp.float32).reshape(b, 1)

    packed = pl.pallas_call(
        functools.partial(
            _fused_lightgcn_kernel, n_layers=N_LAYERS, n_m=n_m, n_a=n_a,
            n_views=NUM_VIEWS, temp=SSL_TEMP),
        out_shape=jax.ShapeDtypeStruct((1, LANE), jnp.float32),
        in_specs=[_VMEM] * 13,
        out_specs=_VMEM,
    )(graphs_flat, mm_bf, aa_bf, all0, hm0, ha0,
      col_i32(mashups), col_i32(pos_apis), col_i32(neg_apis),
      col_i32(sm), col_i32(sa), col_f32(mask_m), col_f32(mask_a))

    return packed[0, 0], packed[0, 1], packed[0, 2], packed[0, 3]


# ============================ synthetic setup ============================

def _sym_normalize(adj):
    deg = jnp.sum(adj, axis=1)
    d_inv_sqrt = jnp.where(deg > 0, 1.0 / jnp.sqrt(deg), 0.0)
    return adj * d_inv_sqrt[:, None] * d_inv_sqrt[None, :]


def _bipartite_graph(r):
    # [[0, R], [R^T, 0]] with symmetric normalization (dataset.getSparseGraph()).
    n_m, n_a = r.shape
    top = jnp.concatenate([jnp.zeros((n_m, n_m), jnp.float32), r], axis=1)
    bot = jnp.concatenate([r.T, jnp.zeros((n_a, n_a), jnp.float32)], axis=1)
    return _sym_normalize(jnp.concatenate([top, bot], axis=0))


def _homo_graph(key, n, p=0.2):
    a = (jax.random.uniform(key, (n, n)) < p).astype(jnp.float32)
    a = jnp.maximum(a, a.T)
    a = a + jnp.eye(n, dtype=jnp.float32)
    return _sym_normalize(a)


def _xavier_uniform(key, shape):
    fan_out, fan_in = shape
    a = (6.0 / (fan_in + fan_out)) ** 0.5
    return jax.random.uniform(key, shape, jnp.float32, -a, a)


if __name__ == "__main__":
    key = jax.random.PRNGKey(0)
    ks = jax.random.split(key, 12)

    # embeddings (xavier_uniform, gain=1)
    emb_mashup = _xavier_uniform(ks[0], (NUM_MASHUPS, LATENT_DIM))
    emb_api = _xavier_uniform(ks[1], (NUM_APIS, LATENT_DIM))
    emb_mm = _xavier_uniform(ks[2], (NUM_MASHUPS, LATENT_DIM))
    emb_aa = _xavier_uniform(ks[3], (NUM_APIS, LATENT_DIM))
    params = (emb_mashup, emb_api, emb_mm, emb_aa)

    # graphs — TODO(synk): dataset.getSparseGraph*/getDiffSparseGraph build scipy
    # sparse matrices from interaction files; here we build dense normalized
    # adjacency directly from synthetic random interactions.
    r0 = (jax.random.uniform(ks[4], (NUM_MASHUPS, NUM_APIS)) < 0.2).astype(jnp.float32)
    r1 = (jax.random.uniform(ks[5], (NUM_MASHUPS, NUM_APIS)) < 0.2).astype(jnp.float32)
    r2 = (jax.random.uniform(ks[6], (NUM_MASHUPS, NUM_APIS)) < 0.2).astype(jnp.float32)
    graph = _bipartite_graph(r0)
    diff_graph1 = _bipartite_graph(r1)
    diff_graph2 = _bipartite_graph(r2)
    mm_graph = _homo_graph(ks[7], NUM_MASHUPS)
    aa_graph = _homo_graph(ks[8], NUM_APIS)
    graphs = (graph, mm_graph, aa_graph, diff_graph1, diff_graph2)

    mashups = jax.random.randint(ks[9], (BATCH,), 0, NUM_MASHUPS)
    pos_apis = jax.random.randint(ks[10], (BATCH,), 0, NUM_APIS)
    neg_apis = jax.random.randint(ks[11], (BATCH,), 0, NUM_APIS)

    loss, reg_loss, ssl_m, ssl_a = lightgcn_forward(
        params, graphs, mashups, pos_apis, neg_apis)
    jax.block_until_ready((loss, reg_loss, ssl_m, ssl_a))
    print("KERNEL_OK")
</pallas_src>

<mosaic_0001>
module attributes {stable_mosaic.version = 11 : i64} {
  func.func @_fused_lightgcn_kernel(%arg0: memref<192x64xbf16, #tpu.memory_space<vmem>>, %arg1: memref<24x24xbf16, #tpu.memory_space<vmem>>, %arg2: memref<40x40xbf16, #tpu.memory_space<vmem>>, %arg3: memref<64x128xf32, #tpu.memory_space<vmem>>, %arg4: memref<24x128xf32, #tpu.memory_space<vmem>>, %arg5: memref<40x128xf32, #tpu.memory_space<vmem>>, %arg6: memref<8x1xi32, #tpu.memory_space<vmem>>, %arg7: memref<8x1xi32, #tpu.memory_space<vmem>>, %arg8: memref<8x1xi32, #tpu.memory_space<vmem>>, %arg9: memref<8x1xi32, #tpu.memory_space<vmem>>, %arg10: memref<8x1xi32, #tpu.memory_space<vmem>>, %arg11: memref<8x1xf32, #tpu.memory_space<vmem>>, %arg12: memref<8x1xf32, #tpu.memory_space<vmem>>, %arg13: memref<1x128xf32, #tpu.memory_space<vmem>>) attributes {dimension_semantics = [], scalar_prefetch = 0 : i64, scratch_operands = 0 : i64, tpu.core_type = #tpu.core_type<tc>} {
    %c0 = arith.constant 0 : index
    %c0_0 = arith.constant 0 : index
    %0 = vector.load %arg0[%c0, %c0_0] : memref<192x64xbf16, #tpu.memory_space<vmem>>, vector<192x64xbf16>
    %c0_1 = arith.constant 0 : index
    %c0_2 = arith.constant 0 : index
    %1 = vector.load %arg3[%c0_1, %c0_2] : memref<64x128xf32, #tpu.memory_space<vmem>>, vector<64x128xf32>
    %c0_3 = arith.constant 0 : index
    %c0_4 = arith.constant 0 : index
    %2 = vector.load %arg1[%c0_3, %c0_4] : memref<24x24xbf16, #tpu.memory_space<vmem>>, vector<24x24xbf16>
    %c0_5 = arith.constant 0 : index
    %c0_6 = arith.constant 0 : index
    %3 = vector.load %arg4[%c0_5, %c0_6] : memref<24x128xf32, #tpu.memory_space<vmem>>, vector<24x128xf32>
    %4 = arith.truncf %3 : vector<24x128xf32> to vector<24x128xbf16>
    %cst = arith.constant dense<0.000000e+00> : vector<24x128xf32>
    %5 = tpu.matmul %2, %4, %cst {dimension_numbers = #tpu.dot_dimension_numbers<[1], [0], [0], [1], [0, 0, 1, 1], [], []>} : vector<24x24xbf16>, vector<24x128xbf16>, vector<24x128xf32> -> vector<24x128xf32>
    %c0_7 = arith.constant 0 : index
    %c0_8 = arith.constant 0 : index
    %6 = vector.load %arg2[%c0_7, %c0_8] : memref<40x40xbf16, #tpu.memory_space<vmem>>, vector<40x40xbf16>
    %c0_9 = arith.constant 0 : index
    %c0_10 = arith.constant 0 : index
    %7 = vector.load %arg5[%c0_9, %c0_10] : memref<40x128xf32, #tpu.memory_space<vmem>>, vector<40x128xf32>
    %8 = arith.truncf %7 : vector<40x128xf32> to vector<40x128xbf16>
    %cst_11 = arith.constant dense<0.000000e+00> : vector<40x128xf32>
    %9 = tpu.matmul %6, %8, %cst_11 {dimension_numbers = #tpu.dot_dimension_numbers<[1], [0], [0], [1], [0, 0, 1, 1], [], []>} : vector<40x40xbf16>, vector<40x128xbf16>, vector<40x128xf32> -> vector<40x128xf32>
    %10 = tpu.concatenate %5, %9 in 0 : vector<24x128xf32>, vector<40x128xf32> -> vector<64x128xf32>
    %11 = arith.truncf %1 : vector<64x128xf32> to vector<64x128xbf16>
    %cst_12 = arith.constant dense<0.000000e+00> : vector<192x128xf32>
    %12 = tpu.matmul %0, %11, %cst_12 {dimension_numbers = #tpu.dot_dimension_numbers<[1], [0], [0], [1], [0, 0, 1, 1], [], []>} : vector<192x64xbf16>, vector<64x128xbf16>, vector<192x128xf32> -> vector<192x128xf32>
    %13 = vector.extract_strided_slice %12 {offsets = [0, 0], sizes = [64, 128], strides = [1, 1]} : vector<192x128xf32> to vector<64x128xf32>
    %14 = arith.addf %13, %10 : vector<64x128xf32>
    %cst_13 = arith.constant 5.000000e-01 : f32
    %15 = vector.broadcast %cst_13 : f32 to vector<64x128xf32>
    %16 = arith.mulf %15, %14 : vector<64x128xf32>
    %17 = arith.addf %1, %16 : vector<64x128xf32>
    %18 = vector.extract_strided_slice %12 {offsets = [64, 0], sizes = [64, 128], strides = [1, 1]} : vector<192x128xf32> to vector<64x128xf32>
    %19 = arith.addf %18, %10 : vector<64x128xf32>
    %cst_14 = arith.constant 5.000000e-01 : f32
    %20 = vector.broadcast %cst_14 : f32 to vector<64x128xf32>
    %21 = arith.mulf %20, %19 : vector<64x128xf32>
    %22 = arith.addf %1, %21 : vector<64x128xf32>
    %23 = vector.extract_strided_slice %12 {offsets = [128, 0], sizes = [64, 128], strides = [1, 1]} : vector<192x128xf32> to vector<64x128xf32>
    %24 = arith.addf %23, %10 : vector<64x128xf32>
    %cst_15 = arith.constant 5.000000e-01 : f32
    %25 = vector.broadcast %cst_15 : f32 to vector<64x128xf32>
    %26 = arith.mulf %25, %24 : vector<64x128xf32>
    %27 = arith.addf %1, %26 : vector<64x128xf32>
    %28 = vector.extract_strided_slice %0 {offsets = [0, 0], sizes = [64, 64], strides = [1, 1]} : vector<192x64xbf16> to vector<64x64xbf16>
    %29 = arith.truncf %16 : vector<64x128xf32> to vector<64x128xbf16>
    %cst_16 = arith.constant dense<0.000000e+00> : vector<64x128xf32>
    %30 = tpu.matmul %28, %29, %cst_16 {dimension_numbers = #tpu.dot_dimension_numbers<[1], [0], [0], [1], [0, 0, 1, 1], [], []>} : vector<64x64xbf16>, vector<64x128xbf16>, vector<64x128xf32> -> vector<64x128xf32>
    %31 = arith.addf %30, %10 : vector<64x128xf32>
    %cst_17 = arith.constant 5.000000e-01 : f32
    %32 = vector.broadcast %cst_17 : f32 to vector<64x128xf32>
    %33 = arith.mulf %32, %31 : vector<64x128xf32>
    %34 = arith.addf %17, %33 : vector<64x128xf32>
    %35 = vector.extract_strided_slice %0 {offsets = [64, 0], sizes = [64, 64], strides = [1, 1]} : vector<192x64xbf16> to vector<64x64xbf16>
    %36 = arith.truncf %21 : vector<64x128xf32> to vector<64x128xbf16>
    %cst_18 = arith.constant dense<0.000000e+00> : vector<64x128xf32>
    %37 = tpu.matmul %35, %36, %cst_18 {dimension_numbers = #tpu.dot_dimension_numbers<[1], [0], [0], [1], [0, 0, 1, 1], [], []>} : vector<64x64xbf16>, vector<64x128xbf16>, vector<64x128xf32> -> vector<64x128xf32>
    %38 = arith.addf %37, %10 : vector<64x128xf32>
    %cst_19 = arith.constant 5.000000e-01 : f32
    %39 = vector.broadcast %cst_19 : f32 to vector<64x128xf32>
    %40 = arith.mulf %39, %38 : vector<64x128xf32>
    %41 = arith.addf %22, %40 : vector<64x128xf32>
    %42 = vector.extract_strided_slice %0 {offsets = [128, 0], sizes = [64, 64], strides = [1, 1]} : vector<192x64xbf16> to vector<64x64xbf16>
    %43 = arith.truncf %26 : vector<64x128xf32> to vector<64x128xbf16>
    %cst_20 = arith.constant dense<0.000000e+00> : vector<64x128xf32>
    %44 = tpu.matmul %42, %43, %cst_20 {dimension_numbers = #tpu.dot_dimension_numbers<[1], [0], [0], [1], [0, 0, 1, 1], [], []>} : vector<64x64xbf16>, vector<64x128xbf16>, vector<64x128xf32> -> vector<64x128xf32>
    %45 = arith.addf %44, %10 : vector<64x128xf32>
    %cst_21 = arith.constant 5.000000e-01 : f32
    %46 = vector.broadcast %cst_21 : f32 to vector<64x128xf32>
    %47 = arith.mulf %46, %45 : vector<64x128xf32>
    %48 = arith.addf %27, %47 : vector<64x128xf32>
    %cst_22 = arith.constant 0.333333343 : f32
    %49 = vector.broadcast %cst_22 : f32 to vector<64x128xf32>
    %50 = arith.mulf %34, %49 : vector<64x128xf32>
    %cst_23 = arith.constant 0.333333343 : f32
    %51 = vector.broadcast %cst_23 : f32 to vector<64x128xf32>
    %52 = arith.mulf %41, %51 : vector<64x128xf32>
    %cst_24 = arith.constant 0.333333343 : f32
    %53 = vector.broadcast %cst_24 : f32 to vector<64x128xf32>
    %54 = arith.mulf %48, %53 : vector<64x128xf32>
    %c0_25 = arith.constant 0 : index
    %c0_26 = arith.constant 0 : index
    %55 = vector.load %arg6[%c0_25, %c0_26] : memref<8x1xi32, #tpu.memory_space<vmem>>, vector<8x1xi32>
    %56 = tpu.iota {dimensions = array<i32: 1>} : vector<8x24xi32>
    %57 = vector.broadcast %55 : vector<8x1xi32> to vector<8x24xi32>
    %58 = arith.cmpi eq, %56, %57 : vector<8x24xi32>
    %59 = arith.extui %58 : vector<8x24xi1> to vector<8x24xi32>
    %60 = arith.sitofp %59 : vector<8x24xi32> to vector<8x24xf32>
    %c0_27 = arith.constant 0 : index
    %c0_28 = arith.constant 0 : index
    %61 = vector.load %arg7[%c0_27, %c0_28] : memref<8x1xi32, #tpu.memory_space<vmem>>, vector<8x1xi32>
    %62 = tpu.iota {dimensions = array<i32: 1>} : vector<8x40xi32>
    %63 = vector.broadcast %61 : vector<8x1xi32> to vector<8x40xi32>
    %64 = arith.cmpi eq, %62, %63 : vector<8x40xi32>
    %65 = arith.extui %64 : vector<8x40xi1> to vector<8x40xi32>
    %66 = arith.sitofp %65 : vector<8x40xi32> to vector<8x40xf32>
    %c0_29 = arith.constant 0 : index
    %c0_30 = arith.constant 0 : index
    %67 = vector.load %arg8[%c0_29, %c0_30] : memref<8x1xi32, #tpu.memory_space<vmem>>, vector<8x1xi32>
    %68 = tpu.iota {dimensions = array<i32: 1>} : vector<8x40xi32>
    %69 = vector.broadcast %67 : vector<8x1xi32> to vector<8x40xi32>
    %70 = arith.cmpi eq, %68, %69 : vector<8x40xi32>
    %71 = arith.extui %70 : vector<8x40xi1> to vector<8x40xi32>
    %72 = arith.sitofp %71 : vector<8x40xi32> to vector<8x40xf32>
    %c0_31 = arith.constant 0 : index
    %c0_32 = arith.constant 0 : index
    %73 = vector.load %arg9[%c0_31, %c0_32] : memref<8x1xi32, #tpu.memory_space<vmem>>, vector<8x1xi32>
    %74 = tpu.iota {dimensions = array<i32: 1>} : vector<8x24xi32>
    %75 = vector.broadcast %73 : vector<8x1xi32> to vector<8x24xi32>
    %76 = arith.cmpi eq, %74, %75 : vector<8x24xi32>
    %77 = arith.extui %76 : vector<8x24xi1> to vector<8x24xi32>
    %78 = arith.sitofp %77 : vector<8x24xi32> to vector<8x24xf32>
    %c0_33 = arith.constant 0 : index
    %c0_34 = arith.constant 0 : index
    %79 = vector.load %arg10[%c0_33, %c0_34] : memref<8x1xi32, #tpu.memory_space<vmem>>, vector<8x1xi32>
    %80 = tpu.iota {dimensions = array<i32: 1>} : vector<8x40xi32>
    %81 = vector.broadcast %79 : vector<8x1xi32> to vector<8x40xi32>
    %82 = arith.cmpi eq, %80, %81 : vector<8x40xi32>
    %83 = arith.extui %82 : vector<8x40xi1> to vector<8x40xi32>
    %84 = arith.sitofp %83 : vector<8x40xi32> to vector<8x40xf32>
    %85 = vector.extract_strided_slice %50 {offsets = [0, 0], sizes = [24, 128], strides = [1, 1]} : vector<64x128xf32> to vector<24x128xf32>
    %86 = vector.extract_strided_slice %50 {offsets = [24, 0], sizes = [40, 128], strides = [1, 1]} : vector<64x128xf32> to vector<40x128xf32>
    %cst_35 = arith.constant dense<0.000000e+00> : vector<8x128xf32>
    %87 = tpu.matmul %60, %85, %cst_35 {dimension_numbers = #tpu.dot_dimension_numbers<[1], [0], [0], [1], [0, 0, 1, 1], [], []>} : vector<8x24xf32>, vector<24x128xf32>, vector<8x128xf32> -> vector<8x128xf32>
    %cst_36 = arith.constant dense<0.000000e+00> : vector<8x128xf32>
    %88 = tpu.matmul %66, %86, %cst_36 {dimension_numbers = #tpu.dot_dimension_numbers<[1], [0], [0], [1], [0, 0, 1, 1], [], []>} : vector<8x40xf32>, vector<40x128xf32>, vector<8x128xf32> -> vector<8x128xf32>
    %cst_37 = arith.constant dense<0.000000e+00> : vector<8x128xf32>
    %89 = tpu.matmul %72, %86, %cst_37 {dimension_numbers = #tpu.dot_dimension_numbers<[1], [0], [0], [1], [0, 0, 1, 1], [], []>} : vector<8x40xf32>, vector<40x128xf32>, vector<8x128xf32> -> vector<8x128xf32>
    %90 = arith.mulf %87, %88 : vector<8x128xf32>
    %cst_38 = arith.constant dense<0.000000e+00> : vector<8xf32>
    %91 = vector.multi_reduction <add>, %90, %cst_38 [1] : vector<8x128xf32> to vector<8xf32>
    %92 = vector.shape_cast %91 : vector<8xf32> to vector<8x1xf32>
    %93 = arith.mulf %87, %89 : vector<8x128xf32>
    %cst_39 = arith.constant dense<0.000000e+00> : vector<8xf32>
    %94 = vector.multi_reduction <add>, %93, %cst_39 [1] : vector<8x128xf32> to vector<8xf32>
    %95 = vector.shape_cast %94 : vector<8xf32> to vector<8x1xf32>
    %96 = arith.subf %95, %92 : vector<8x1xf32>
    %cst_40 = arith.constant 0.000000e+00 : f32
    %97 = vector.broadcast %cst_40 : f32 to vector<8x1xf32>
    %98 = arith.maximumf %96, %97 : vector<8x1xf32>
    %99 = math.absf %96 : vector<8x1xf32>
    %cst_41 = arith.constant 0.000000e+00 : f32
    %100 = vector.broadcast %cst_41 : f32 to vector<8x1xf32>
    %101 = arith.subf %100, %99 : vector<8x1xf32>
    %102 = math.exp %101 : vector<8x1xf32>
    %cst_42 = arith.constant 1.000000e+00 : f32
    %103 = vector.broadcast %cst_42 : f32 to vector<8x1xf32>
    %104 = arith.addf %103, %102 : vector<8x1xf32>
    %105 = math.log %104 : vector<8x1xf32>
    %106 = arith.addf %98, %105 : vector<8x1xf32>
    %107 = vector.shape_cast %106 : vector<8x1xf32> to vector<1x8x1xf32>
    %cst_43 = arith.constant dense<0.000000e+00> : vector<1xf32>
    %108 = vector.multi_reduction <add>, %107, %cst_43 [1, 2] : vector<1x8x1xf32> to vector<1xf32>
    %109 = vector.shape_cast %108 : vector<1xf32> to vector<1x1x1xf32>
    %110 = vector.extract %109[0, 0, 0] : f32 from vector<1x1x1xf32>
    %cst_44 = arith.constant 8.000000e+00 : f32
    %111 = arith.divf %110, %cst_44 : f32
    %cst_45 = arith.constant 0.000000e+00 : f32
    %112 = arith.addf %cst_45, %111 : f32
    %113 = arith.mulf %87, %87 : vector<8x128xf32>
    %114 = vector.shape_cast %113 : vector<8x128xf32> to vector<1x8x128xf32>
    %cst_46 = arith.constant dense<0.000000e+00> : vector<1xf32>
    %115 = vector.multi_reduction <add>, %114, %cst_46 [1, 2] : vector<1x8x128xf32> to vector<1xf32>
    %116 = vector.shape_cast %115 : vector<1xf32> to vector<1x1x1xf32>
    %117 = vector.extract %116[0, 0, 0] : f32 from vector<1x1x1xf32>
    %118 = arith.mulf %88, %88 : vector<8x128xf32>
    %119 = vector.shape_cast %118 : vector<8x128xf32> to vector<1x8x128xf32>
    %cst_47 = arith.constant dense<0.000000e+00> : vector<1xf32>
    %120 = vector.multi_reduction <add>, %119, %cst_47 [1, 2] : vector<1x8x128xf32> to vector<1xf32>
    %121 = vector.shape_cast %120 : vector<1xf32> to vector<1x1x1xf32>
    %122 = vector.extract %121[0, 0, 0] : f32 from vector<1x1x1xf32>
    %123 = arith.addf %117, %122 : f32
    %124 = arith.mulf %89, %89 : vector<8x128xf32>
    %125 = vector.shape_cast %124 : vector<8x128xf32> to vector<1x8x128xf32>
    %cst_48 = arith.constant dense<0.000000e+00> : vector<1xf32>
    %126 = vector.multi_reduction <add>, %125, %cst_48 [1, 2] : vector<1x8x128xf32> to vector<1xf32>
    %127 = vector.shape_cast %126 : vector<1xf32> to vector<1x1x1xf32>
    %128 = vector.extract %127[0, 0, 0] : f32 from vector<1x1x1xf32>
    %129 = arith.addf %123, %128 : f32
    %cst_49 = arith.constant 5.000000e-01 : f32
    %130 = arith.mulf %cst_49, %129 : f32
    %cst_50 = arith.constant 8.000000e+00 : f32
    %131 = arith.divf %130, %cst_50 : f32
    %cst_51 = arith.constant 0.000000e+00 : f32
    %132 = arith.addf %cst_51, %131 : f32
    %133 = vector.extract_strided_slice %52 {offsets = [0, 0], sizes = [24, 128], strides = [1, 1]} : vector<64x128xf32> to vector<24x128xf32>
    %134 = vector.extract_strided_slice %52 {offsets = [24, 0], sizes = [40, 128], strides = [1, 1]} : vector<64x128xf32> to vector<40x128xf32>
    %cst_52 = arith.constant dense<0.000000e+00> : vector<8x128xf32>
    %135 = tpu.matmul %60, %133, %cst_52 {dimension_numbers = #tpu.dot_dimension_numbers<[1], [0], [0], [1], [0, 0, 1, 1], [], []>} : vector<8x24xf32>, vector<24x128xf32>, vector<8x128xf32> -> vector<8x128xf32>
    %cst_53 = arith.constant dense<0.000000e+00> : vector<8x128xf32>
    %136 = tpu.matmul %66, %134, %cst_53 {dimension_numbers = #tpu.dot_dimension_numbers<[1], [0], [0], [1], [0, 0, 1, 1], [], []>} : vector<8x40xf32>, vector<40x128xf32>, vector<8x128xf32> -> vector<8x128xf32>
    %cst_54 = arith.constant dense<0.000000e+00> : vector<8x128xf32>
    %137 = tpu.matmul %72, %134, %cst_54 {dimension_numbers = #tpu.dot_dimension_numbers<[1], [0], [0], [1], [0, 0, 1, 1], [], []>} : vector<8x40xf32>, vector<40x128xf32>, vector<8x128xf32> -> vector<8x128xf32>
    %138 = arith.mulf %135, %136 : vector<8x128xf32>
    %cst_55 = arith.constant dense<0.000000e+00> : vector<8xf32>
    %139 = vector.multi_reduction <add>, %138, %cst_55 [1] : vector<8x128xf32> to vector<8xf32>
    %140 = vector.shape_cast %139 : vector<8xf32> to vector<8x1xf32>
    %141 = arith.mulf %135, %137 : vector<8x128xf32>
    %cst_56 = arith.constant dense<0.000000e+00> : vector<8xf32>
    %142 = vector.multi_reduction <add>, %141, %cst_56 [1] : vector<8x128xf32> to vector<8xf32>
    %143 = vector.shape_cast %142 : vector<8xf32> to vector<8x1xf32>
    %144 = arith.subf %143, %140 : vector<8x1xf32>
    %cst_57 = arith.constant 0.000000e+00 : f32
    %145 = vector.broadcast %cst_57 : f32 to vector<8x1xf32>
    %146 = arith.maximumf %144, %145 : vector<8x1xf32>
    %147 = math.absf %144 : vector<8x1xf32>
    %cst_58 = arith.constant 0.000000e+00 : f32
    %148 = vector.broadcast %cst_58 : f32 to vector<8x1xf32>
    %149 = arith.subf %148, %147 : vector<8x1xf32>
    %150 = math.exp %149 : vector<8x1xf32>
    %cst_59 = arith.constant 1.000000e+00 : f32
    %151 = vector.broadcast %cst_59 : f32 to vector<8x1xf32>
    %152 = arith.addf %151, %150 : vector<8x1xf32>
    %153 = math.log %152 : vector<8x1xf32>
    %154 = arith.addf %146, %153 : vector<8x1xf32>
    %155 = vector.shape_cast %154 : vector<8x1xf32> to vector<1x8x1xf32>
    %cst_60 = arith.constant dense<0.000000e+00> : vector<1xf32>
    %156 = vector.multi_reduction <add>, %155, %cst_60 [1, 2] : vector<1x8x1xf32> to vector<1xf32>
    %157 = vector.shape_cast %156 : vector<1xf32> to vector<1x1x1xf32>
    %158 = vector.extract %157[0, 0, 0] : f32 from vector<1x1x1xf32>
    %cst_61 = arith.constant 8.000000e+00 : f32
    %159 = arith.divf %158, %cst_61 : f32
    %160 = arith.addf %112, %159 : f32
    %161 = arith.mulf %135, %135 : vector<8x128xf32>
    %162 = vector.shape_cast %161 : vector<8x128xf32> to vector<1x8x128xf32>
    %cst_62 = arith.constant dense<0.000000e+00> : vector<1xf32>
    %163 = vector.multi_reduction <add>, %162, %cst_62 [1, 2] : vector<1x8x128xf32> to vector<1xf32>
    %164 = vector.shape_cast %163 : vector<1xf32> to vector<1x1x1xf32>
    %165 = vector.extract %164[0, 0, 0] : f32 from vector<1x1x1xf32>
    %166 = arith.mulf %136, %136 : vector<8x128xf32>
    %167 = vector.shape_cast %166 : vector<8x128xf32> to vector<1x8x128xf32>
    %cst_63 = arith.constant dense<0.000000e+00> : vector<1xf32>
    %168 = vector.multi_reduction <add>, %167, %cst_63 [1, 2] : vector<1x8x128xf32> to vector<1xf32>
    %169 = vector.shape_cast %168 : vector<1xf32> to vector<1x1x1xf32>
    %170 = vector.extract %169[0, 0, 0] : f32 from vector<1x1x1xf32>
    %171 = arith.addf %165, %170 : f32
    %172 = arith.mulf %137, %137 : vector<8x128xf32>
    %173 = vector.shape_cast %172 : vector<8x128xf32> to vector<1x8x128xf32>
    %cst_64 = arith.constant dense<0.000000e+00> : vector<1xf32>
    %174 = vector.multi_reduction <add>, %173, %cst_64 [1, 2] : vector<1x8x128xf32> to vector<1xf32>
    %175 = vector.shape_cast %174 : vector<1xf32> to vector<1x1x1xf32>
    %176 = vector.extract %175[0, 0, 0] : f32 from vector<1x1x1xf32>
    %177 = arith.addf %171, %176 : f32
    %cst_65 = arith.constant 5.000000e-01 : f32
    %178 = arith.mulf %cst_65, %177 : f32
    %cst_66 = arith.constant 8.000000e+00 : f32
    %179 = arith.divf %178, %cst_66 : f32
    %180 = arith.addf %132, %179 : f32
    %181 = vector.extract_strided_slice %54 {offsets = [0, 0], sizes = [24, 128], strides = [1, 1]} : vector<64x128xf32> to vector<24x128xf32>
    %182 = vector.extract_strided_slice %54 {offsets = [24, 0], sizes = [40, 128], strides = [1, 1]} : vector<64x128xf32> to vector<40x128xf32>
    %cst_67 = arith.constant dense<0.000000e+00> : vector<8x128xf32>
    %183 = tpu.matmul %60, %181, %cst_67 {dimension_numbers = #tpu.dot_dimension_numbers<[1], [0], [0], [1], [0, 0, 1, 1], [], []>} : vector<8x24xf32>, vector<24x128xf32>, vector<8x128xf32> -> vector<8x128xf32>
    %cst_68 = arith.constant dense<0.000000e+00> : vector<8x128xf32>
    %184 = tpu.matmul %66, %182, %cst_68 {dimension_numbers = #tpu.dot_dimension_numbers<[1], [0], [0], [1], [0, 0, 1, 1], [], []>} : vector<8x40xf32>, vector<40x128xf32>, vector<8x128xf32> -> vector<8x128xf32>
    %cst_69 = arith.constant dense<0.000000e+00> : vector<8x128xf32>
    %185 = tpu.matmul %72, %182, %cst_69 {dimension_numbers = #tpu.dot_dimension_numbers<[1], [0], [0], [1], [0, 0, 1, 1], [], []>} : vector<8x40xf32>, vector<40x128xf32>, vector<8x128xf32> -> vector<8x128xf32>
    %186 = arith.mulf %183, %184 : vector<8x128xf32>
    %cst_70 = arith.constant dense<0.000000e+00> : vector<8xf32>
    %187 = vector.multi_reduction <add>, %186, %cst_70 [1] : vector<8x128xf32> to vector<8xf32>
    %188 = vector.shape_cast %187 : vector<8xf32> to vector<8x1xf32>
    %189 = arith.mulf %183, %185 : vector<8x128xf32>
    %cst_71 = arith.constant dense<0.000000e+00> : vector<8xf32>
    %190 = vector.multi_reduction <add>, %189, %cst_71 [1] : vector<8x128xf32> to vector<8xf32>
    %191 = vector.shape_cast %190 : vector<8xf32> to vector<8x1xf32>
    %192 = arith.subf %191, %188 : vector<8x1xf32>
    %cst_72 = arith.constant 0.000000e+00 : f32
    %193 = vector.broadcast %cst_72 : f32 to vector<8x1xf32>
    %194 = arith.maximumf %192, %193 : vector<8x1xf32>
    %195 = math.absf %192 : vector<8x1xf32>
    %cst_73 = arith.constant 0.000000e+00 : f32
    %196 = vector.broadcast %cst_73 : f32 to vector<8x1xf32>
    %197 = arith.subf %196, %195 : vector<8x1xf32>
    %198 = math.exp %197 : vector<8x1xf32>
    %cst_74 = arith.constant 1.000000e+00 : f32
    %199 = vector.broadcast %cst_74 : f32 to vector<8x1xf32>
    %200 = arith.addf %199, %198 : vector<8x1xf32>
    %201 = math.log %200 : vector<8x1xf32>
    %202 = arith.addf %194, %201 : vector<8x1xf32>
    %203 = vector.shape_cast %202 : vector<8x1xf32> to vector<1x8x1xf32>
    %cst_75 = arith.constant dense<0.000000e+00> : vector<1xf32>
    %204 = vector.multi_reduction <add>, %203, %cst_75 [1, 2] : vector<1x8x1xf32> to vector<1xf32>
    %205 = vector.shape_cast %204 : vector<1xf32> to vector<1x1x1xf32>
    %206 = vector.extract %205[0, 0, 0] : f32 from vector<1x1x1xf32>
    %cst_76 = arith.constant 8.000000e+00 : f32
    %207 = arith.divf %206, %cst_76 : f32
    %208 = arith.addf %160, %207 : f32
    %209 = arith.mulf %183, %183 : vector<8x128xf32>
    %210 = vector.shape_cast %209 : vector<8x128xf32> to vector<1x8x128xf32>
    %cst_77 = arith.constant dense<0.000000e+00> : vector<1xf32>
    %211 = vector.multi_reduction <add>, %210, %cst_77 [1, 2] : vector<1x8x128xf32> to vector<1xf32>
    %212 = vector.shape_cast %211 : vector<1xf32> to vector<1x1x1xf32>
    %213 = vector.extract %212[0, 0, 0] : f32 from vector<1x1x1xf32>
    %214 = arith.mulf %184, %184 : vector<8x128xf32>
    %215 = vector.shape_cast %214 : vector<8x128xf32> to vector<1x8x128xf32>
    %cst_78 = arith.constant dense<0.000000e+00> : vector<1xf32>
    %216 = vector.multi_reduction <add>, %215, %cst_78 [1, 2] : vector<1x8x128xf32> to vector<1xf32>
    %217 = vector.shape_cast %216 : vector<1xf32> to vector<1x1x1xf32>
    %218 = vector.extract %217[0, 0, 0] : f32 from vector<1x1x1xf32>
    %219 = arith.addf %213, %218 : f32
    %220 = arith.mulf %185, %185 : vector<8x128xf32>
    %221 = vector.shape_cast %220 : vector<8x128xf32> to vector<1x8x128xf32>
    %cst_79 = arith.constant dense<0.000000e+00> : vector<1xf32>
    %222 = vector.multi_reduction <add>, %221, %cst_79 [1, 2] : vector<1x8x128xf32> to vector<1xf32>
    %223 = vector.shape_cast %222 : vector<1xf32> to vector<1x1x1xf32>
    %224 = vector.extract %223[0, 0, 0] : f32 from vector<1x1x1xf32>
    %225 = arith.addf %219, %224 : f32
    %cst_80 = arith.constant 5.000000e-01 : f32
    %226 = arith.mulf %cst_80, %225 : f32
    %cst_81 = arith.constant 8.000000e+00 : f32
    %227 = arith.divf %226, %cst_81 : f32
    %228 = arith.addf %180, %227 : f32
    %229 = vector.extract_strided_slice %52 {offsets = [0, 0], sizes = [24, 128], strides = [1, 1]} : vector<64x128xf32> to vector<24x128xf32>
    %230 = vector.extract_strided_slice %54 {offsets = [0, 0], sizes = [24, 128], strides = [1, 1]} : vector<64x128xf32> to vector<24x128xf32>
    %231 = vector.extract_strided_slice %52 {offsets = [24, 0], sizes = [40, 128], strides = [1, 1]} : vector<64x128xf32> to vector<40x128xf32>
    %232 = vector.extract_strided_slice %54 {offsets = [24, 0], sizes = [40, 128], strides = [1, 1]} : vector<64x128xf32> to vector<40x128xf32>
    %cst_82 = arith.constant dense<0.000000e+00> : vector<8x128xf32>
    %233 = tpu.matmul %78, %229, %cst_82 {dimension_numbers = #tpu.dot_dimension_numbers<[1], [0], [0], [1], [0, 0, 1, 1], [], []>} : vector<8x24xf32>, vector<24x128xf32>, vector<8x128xf32> -> vector<8x128xf32>
    %cst_83 = arith.constant dense<0.000000e+00> : vector<8x128xf32>
    %234 = tpu.matmul %78, %230, %cst_83 {dimension_numbers = #tpu.dot_dimension_numbers<[1], [0], [0], [1], [0, 0, 1, 1], [], []>} : vector<8x24xf32>, vector<24x128xf32>, vector<8x128xf32> -> vector<8x128xf32>
    %c0_84 = arith.constant 0 : index
    %c0_85 = arith.constant 0 : index
    %235 = vector.load %arg11[%c0_84, %c0_85] : memref<8x1xf32, #tpu.memory_space<vmem>>, vector<8x1xf32>
    %236 = arith.mulf %233, %233 : vector<8x128xf32>
    %cst_86 = arith.constant dense<0.000000e+00> : vector<8xf32>
    %237 = vector.multi_reduction <add>, %236, %cst_86 [1] : vector<8x128xf32> to vector<8xf32>
    %238 = vector.shape_cast %237 : vector<8xf32> to vector<8x1xf32>
    %cst_87 = arith.constant 1.000000e-24 : f32
    %239 = vector.broadcast %cst_87 : f32 to vector<8x1xf32>
    %240 = arith.maximumf %238, %239 : vector<8x1xf32>
    %241 = math.rsqrt %240 : vector<8x1xf32>
    %242 = vector.broadcast %241 : vector<8x1xf32> to vector<8x128xf32>
    %243 = arith.mulf %233, %242 : vector<8x128xf32>
    %244 = arith.mulf %234, %234 : vector<8x128xf32>
    %cst_88 = arith.constant dense<0.000000e+00> : vector<8xf32>
    %245 = vector.multi_reduction <add>, %244, %cst_88 [1] : vector<8x128xf32> to vector<8xf32>
    %246 = vector.shape_cast %245 : vector<8xf32> to vector<8x1xf32>
    %cst_89 = arith.constant 1.000000e-24 : f32
    %247 = vector.broadcast %cst_89 : f32 to vector<8x1xf32>
    %248 = arith.maximumf %246, %247 : vector<8x1xf32>
    %249 = math.rsqrt %248 : vector<8x1xf32>
    %250 = vector.broadcast %249 : vector<8x1xf32> to vector<8x128xf32>
    %251 = arith.mulf %234, %250 : vector<8x128xf32>
    %252 = arith.mulf %243, %251 : vector<8x128xf32>
    %cst_90 = arith.constant dense<0.000000e+00> : vector<8xf32>
    %253 = vector.multi_reduction <add>, %252, %cst_90 [1] : vector<8x128xf32> to vector<8xf32>
    %254 = vector.shape_cast %253 : vector<8xf32> to vector<8x1xf32>
    %cst_91 = arith.constant 5.000000e+00 : f32
    %255 = vector.broadcast %cst_91 : f32 to vector<8x1xf32>
    %256 = arith.mulf %254, %255 : vector<8x1xf32>
    %cst_92 = arith.constant dense<0.000000e+00> : vector<8x8xf32>
    %257 = tpu.matmul %243, %251, %cst_92 {dimension_numbers = #tpu.dot_dimension_numbers<[1], [1], [0], [0], [0, 0, 1, 0], [], []>} : vector<8x128xf32>, vector<8x128xf32>, vector<8x8xf32> -> vector<8x8xf32>
    %cst_93 = arith.constant 5.000000e+00 : f32
    %258 = vector.broadcast %cst_93 : f32 to vector<8x8xf32>
    %259 = arith.mulf %257, %258 : vector<8x8xf32>
    %260 = math.exp %259 : vector<8x8xf32>
    %cst_94 = arith.constant dense<0.000000e+00> : vector<8x1xf32>
    %261 = tpu.matmul %260, %235, %cst_94 {dimension_numbers = #tpu.dot_dimension_numbers<[1], [0], [0], [1], [0, 0, 1, 1], [], []>} : vector<8x8xf32>, vector<8x1xf32>, vector<8x1xf32> -> vector<8x1xf32>
    %262 = math.log %261 : vector<8x1xf32>
    %263 = arith.subf %256, %262 : vector<8x1xf32>
    %264 = arith.mulf %263, %235 : vector<8x1xf32>
    %265 = vector.shape_cast %264 : vector<8x1xf32> to vector<1x8x1xf32>
    %cst_95 = arith.constant dense<0.000000e+00> : vector<1xf32>
    %266 = vector.multi_reduction <add>, %265, %cst_95 [1, 2] : vector<1x8x1xf32> to vector<1xf32>
    %267 = vector.shape_cast %266 : vector<1xf32> to vector<1x1x1xf32>
    %268 = vector.extract %267[0, 0, 0] : f32 from vector<1x1x1xf32>
    %cst_96 = arith.constant 0.000000e+00 : f32
    %269 = arith.subf %cst_96, %268 : f32
    %270 = vector.shape_cast %235 : vector<8x1xf32> to vector<1x8x1xf32>
    %cst_97 = arith.constant dense<0.000000e+00> : vector<1xf32>
    %271 = vector.multi_reduction <add>, %270, %cst_97 [1, 2] : vector<1x8x1xf32> to vector<1xf32>
    %272 = vector.shape_cast %271 : vector<1xf32> to vector<1x1x1xf32>
    %273 = vector.extract %272[0, 0, 0] : f32 from vector<1x1x1xf32>
    %274 = arith.divf %269, %273 : f32
    %cst_98 = arith.constant dense<0.000000e+00> : vector<8x128xf32>
    %275 = tpu.matmul %84, %231, %cst_98 {dimension_numbers = #tpu.dot_dimension_numbers<[1], [0], [0], [1], [0, 0, 1, 1], [], []>} : vector<8x40xf32>, vector<40x128xf32>, vector<8x128xf32> -> vector<8x128xf32>
    %cst_99 = arith.constant dense<0.000000e+00> : vector<8x128xf32>
    %276 = tpu.matmul %84, %232, %cst_99 {dimension_numbers = #tpu.dot_dimension_numbers<[1], [0], [0], [1], [0, 0, 1, 1], [], []>} : vector<8x40xf32>, vector<40x128xf32>, vector<8x128xf32> -> vector<8x128xf32>
    %c0_100 = arith.constant 0 : index
    %c0_101 = arith.constant 0 : index
    %277 = vector.load %arg12[%c0_100, %c0_101] : memref<8x1xf32, #tpu.memory_space<vmem>>, vector<8x1xf32>
    %278 = arith.mulf %275, %275 : vector<8x128xf32>
    %cst_102 = arith.constant dense<0.000000e+00> : vector<8xf32>
    %279 = vector.multi_reduction <add>, %278, %cst_102 [1] : vector<8x128xf32> to vector<8xf32>
    %280 = vector.shape_cast %279 : vector<8xf32> to vector<8x1xf32>
    %cst_103 = arith.constant 1.000000e-24 : f32
    %281 = vector.broadcast %cst_103 : f32 to vector<8x1xf32>
    %282 = arith.maximumf %280, %281 : vector<8x1xf32>
    %283 = math.rsqrt %282 : vector<8x1xf32>
    %284 = vector.broadcast %283 : vector<8x1xf32> to vector<8x128xf32>
    %285 = arith.mulf %275, %284 : vector<8x128xf32>
    %286 = arith.mulf %276, %276 : vector<8x128xf32>
    %cst_104 = arith.constant dense<0.000000e+00> : vector<8xf32>
    %287 = vector.multi_reduction <add>, %286, %cst_104 [1] : vector<8x128xf32> to vector<8xf32>
    %288 = vector.shape_cast %287 : vector<8xf32> to vector<8x1xf32>
    %cst_105 = arith.constant 1.000000e-24 : f32
    %289 = vector.broadcast %cst_105 : f32 to vector<8x1xf32>
    %290 = arith.maximumf %288, %289 : vector<8x1xf32>
    %291 = math.rsqrt %290 : vector<8x1xf32>
    %292 = vector.broadcast %291 : vector<8x1xf32> to vector<8x128xf32>
    %293 = arith.mulf %276, %292 : vector<8x128xf32>
    %294 = arith.mulf %285, %293 : vector<8x128xf32>
    %cst_106 = arith.constant dense<0.000000e+00> : vector<8xf32>
    %295 = vector.multi_reduction <add>, %294, %cst_106 [1] : vector<8x128xf32> to vector<8xf32>
    %296 = vector.shape_cast %295 : vector<8xf32> to vector<8x1xf32>
    %cst_107 = arith.constant 5.000000e+00 : f32
    %297 = vector.broadcast %cst_107 : f32 to vector<8x1xf32>
    %298 = arith.mulf %296, %297 : vector<8x1xf32>
    %cst_108 = arith.constant dense<0.000000e+00> : vector<8x8xf32>
    %299 = tpu.matmul %285, %293, %cst_108 {dimension_numbers = #tpu.dot_dimension_numbers<[1], [1], [0], [0], [0, 0, 1, 0], [], []>} : vector<8x128xf32>, vector<8x128xf32>, vector<8x8xf32> -> vector<8x8xf32>
    %cst_109 = arith.constant 5.000000e+00 : f32
    %300 = vector.broadcast %cst_109 : f32 to vector<8x8xf32>
    %301 = arith.mulf %299, %300 : vector<8x8xf32>
    %302 = math.exp %301 : vector<8x8xf32>
    %cst_110 = arith.constant dense<0.000000e+00> : vector<8x1xf32>
    %303 = tpu.matmul %302, %277, %cst_110 {dimension_numbers = #tpu.dot_dimension_numbers<[1], [0], [0], [1], [0, 0, 1, 1], [], []>} : vector<8x8xf32>, vector<8x1xf32>, vector<8x1xf32> -> vector<8x1xf32>
    %304 = math.log %303 : vector<8x1xf32>
    %305 = arith.subf %298, %304 : vector<8x1xf32>
    %306 = arith.mulf %305, %277 : vector<8x1xf32>
    %307 = vector.shape_cast %306 : vector<8x1xf32> to vector<1x8x1xf32>
    %cst_111 = arith.constant dense<0.000000e+00> : vector<1xf32>
    %308 = vector.multi_reduction <add>, %307, %cst_111 [1, 2] : vector<1x8x1xf32> to vector<1xf32>
    %309 = vector.shape_cast %308 : vector<1xf32> to vector<1x1x1xf32>
    %310 = vector.extract %309[0, 0, 0] : f32 from vector<1x1x1xf32>
    %cst_112 = arith.constant 0.000000e+00 : f32
    %311 = arith.subf %cst_112, %310 : f32
    %312 = vector.shape_cast %277 : vector<8x1xf32> to vector<1x8x1xf32>
    %cst_113 = arith.constant dense<0.000000e+00> : vector<1xf32>
    %313 = vector.multi_reduction <add>, %312, %cst_113 [1, 2] : vector<1x8x1xf32> to vector<1xf32>
    %314 = vector.shape_cast %313 : vector<1xf32> to vector<1x1x1xf32>
    %315 = vector.extract %314[0, 0, 0] : f32 from vector<1x1x1xf32>
    %316 = arith.divf %311, %315 : f32
    %317 = tpu.iota {dimensions = array<i32: 1>} : vector<1x128xi32>
    %c0_i32 = arith.constant 0 : i32
    %318 = vector.broadcast %c0_i32 : i32 to vector<1x128xi32>
    %319 = arith.cmpi eq, %317, %318 : vector<1x128xi32>
    %cst_114 = arith.constant 0.000000e+00 : f32
    %320 = vector.broadcast %208 : f32 to vector<1x128xf32>
    %321 = vector.broadcast %cst_114 : f32 to vector<1x128xf32>
    %322 = arith.select %319, %320, %321 : vector<1x128xi1>, vector<1x128xf32>
    %c1_i32 = arith.constant 1 : i32
    %323 = vector.broadcast %c1_i32 : i32 to vector<1x128xi32>
    %324 = arith.cmpi eq, %317, %323 : vector<1x128xi32>
    %cst_115 = arith.constant 0.000000e+00 : f32
    %325 = vector.broadcast %228 : f32 to vector<1x128xf32>
    %326 = vector.broadcast %cst_115 : f32 to vector<1x128xf32>
    %327 = arith.select %324, %325, %326 : vector<1x128xi1>, vector<1x128xf32>
    %328 = arith.addf %322, %327 : vector<1x128xf32>
    %c2_i32 = arith.constant 2 : i32
    %329 = vector.broadcast %c2_i32 : i32 to vector<1x128xi32>
    %330 = arith.cmpi eq, %317, %329 : vector<1x128xi32>
    %cst_116 = arith.constant 0.000000e+00 : f32
    %331 = vector.broadcast %274 : f32 to vector<1x128xf32>
    %332 = vector.broadcast %cst_116 : f32 to vector<1x128xf32>
    %333 = arith.select %330, %331, %332 : vector<1x128xi1>, vector<1x128xf32>
    %334 = arith.addf %328, %333 : vector<1x128xf32>
    %c3_i32 = arith.constant 3 : i32
    %335 = vector.broadcast %c3_i32 : i32 to vector<1x128xi32>
    %336 = arith.cmpi eq, %317, %335 : vector<1x128xi32>
    %cst_117 = arith.constant 0.000000e+00 : f32
    %337 = vector.broadcast %316 : f32 to vector<1x128xf32>
    %338 = vector.broadcast %cst_117 : f32 to vector<1x128xf32>
    %339 = arith.select %336, %337, %338 : vector<1x128xi1>, vector<1x128xf32>
    %340 = arith.addf %334, %339 : vector<1x128xf32>
    %c0_118 = arith.constant 0 : index
    %c0_119 = arith.constant 0 : index
    %341 = vector.load %arg13[%c0_118, %c0_119] : memref<1x128xf32, #tpu.memory_space<vmem>>, vector<1x128xf32>
    tpu.vector_store %arg13[%c0_118, %c0_119], %340 {strides = array<i32>} : memref<1x128xf32, #tpu.memory_space<vmem>>, vector<1x128xf32>,
    return
  }
}

</mosaic_0001>

<bundles_post_ra>
// kernel: lightgcn_forward.1
= control target key start
LH: loop header
LB: loop body
LE: loop exit
PB: predicated region body
PF: predicated region fallthrough
CT: control target
= control target key end

     0   :  { %v3019_v3 = vmov 0.0   ;;  %vm93_vm0 = vcmask 195584   ;;  %vm3020_vm1 = vmmov 0   ;;  %vm100_vm2 = vcmask 1043456   ;;  %s3726_s4 = inlined_call_operand.vmem [shape: f32[24,128], index: 4, kind: input, shape index: {}]   ;;  %s3727_s1 = inlined_call_operand.vmem [shape: bf16[24,24], index: 1, kind: input, shape index: {}]   ;;  %s3728_s5 = inlined_call_operand.vmem [shape: f32[40,128], index: 5, kind: input, shape index: {}]   ;;  %s3729_s3 = inlined_call_operand.vmem [shape: f32[64,128], index: 3, kind: input, shape index: {}]   ;;  %s3730_s2 = inlined_call_operand.vmem [shape: bf16[40,40], index: 2, kind: input, shape index: {}]   ;;  %s3731_s0 = inlined_call_operand.vmem [shape: bf16[192,64], index: 0, kind: input, shape index: {}]   ;;  %s3732_s6 = inlined_call_operand.vmem [shape: s32[8,1], index: 6, kind: input, shape index: {}]   ;;  %s3733_s7 = inlined_call_operand.vmem [shape: s32[8,1], index: 7, kind: input, shape index: {}]   ;;  %s3734_s8 = inlined_call_operand.vmem [shape: s32[8,1], index: 8, kind: input, shape index: {}]   ;;  %s3735_s9 = inlined_call_operand.vmem [shape: s32[8,1], index: 9, kind: input, shape index: {}]   ;;  %s3736_s10 = inlined_call_operand.vmem [shape: s32[8,1], index: 10, kind: input, shape index: {}]   ;;  %s3737_s11 = inlined_call_operand.vmem [shape: f32[8,1], index: 11, kind: input, shape index: {}]   ;;  %s3738_s12 = inlined_call_operand.vmem [shape: f32[8,1], index: 12, kind: input, shape index: {}]   ;;  %s3739_s13 = inlined_call_operand.vmem [shape: f32[1,128], index: 13, kind: output, shape index: {}]  }
   0x1   :  { %v80_v0 = vld [vmem:[%s3726_s4] sm:$0xff]  ;;  %v81_v1 = vld [vmem:[%s3726_s4 + $0x8] sm:$0xff]  ;;  %v82_v2 = vld [vmem:[%s3726_s4 + $0x10] sm:$0xff]  ;;  %2597 = vmatprep.subr.bf16.mxu1 %v3019_v3  ;;  %2603 = vmatprep.mubr.msk.bf16.mxu1 %vm3020_vm1, %v3019_v3  ;;  %vm311_vm3 = vcmask 523264   ;;  %vm178_vm4 = vcmask 326656   ;;  %v3021_v45 = vmov 0  }
   0x2   :  { %v83_v4 = vpack.c.bf16 %v81_v1, %v80_v0  ;;  %v84_v5 = vpack.c.bf16 %v82_v2, %v82_v2  ;;  %v2970_v6 = vld [vmem:[%s3727_s1] sm:$0xff]   ;;  %v158_v8 = vld [vmem:[%s3728_s5 + $0x8] sm:$0xff]  ;;  %v159_v12 = vld [vmem:[%s3728_s5 + $0x10] sm:$0xff]  ;;  %2968 = vset.pattern.permute.xlu0 %v3021_v45  ;;  %2969 = vset.pattern.permute.xlu1 %v3021_v45  ;;  %vm1939_vm10 = vcmask 64512   ;;  %vm1100_vm11 = vcmask 7168  }
   0x3   :  { %v157_v7 = vld [vmem:[%s3728_s5] sm:$0xff]  ;;  %v3122_v10 = vld [vmem:[%s3729_s3 + $0x8] sm:$0xff]  ;;  %2593 = vmatprep.mubr.msk.bf16.mxu0 %vm93_vm0, %v2970_v6  ;;  %v160_v13 = vld [vmem:[%s3728_s5 + $0x18] sm:$0xff] }
   0x4   :  { %2589 = vmatprep.subr.bf16.mxu0 %v83_v4  ;;  %v3117_v9 = vld [vmem:[%s3729_s3] sm:$0xff]  ;;  %v162_v11 = vpack.c.bf16 %v158_v8, %v157_v7  ;;  %v102_v14 = vsel %vm100_vm2, %v84_v5, 0  ;;  %v3138_v16 = vld [vmem:[%s3729_s3 + $0x10] sm:$0xff]  ;;  %v163_v18 = vpack.c.bf16 %v160_v13, %v159_v12  ;;  %v3146_v19 = vld [vmem:[%s3729_s3 + $0x18] sm:$0xff] }
   0x5   :  { %2590 = vmatpush3.bf16.msra.mxu0 %v83_v4  ;;  %v247_v15 = vpack.c.bf16 %v3122_v10, %v3117_v9  ;;  %v161_v17 = vld [vmem:[%s3728_s5 + $0x20] sm:$0xff]  ;;  %v2971_v20 = vld [vmem:[%s3727_s1 + $0x8] ss:$0 sps:$4 sm:$0xff]   ;;  %v248_v23 = vpack.c.bf16 %v3146_v19, %v3138_v16  ;;  %v3179_v29 = vld [vmem:[%s3729_s3 + $0x30] sm:$0xff] }
   0x6   :  { %2927 = vmatprep.subr.msk.bf16.mxu0 %vm100_vm2, %v84_v5  ;;  %2598 = vmatpush3.bf16.msra.mxu1 %v162_v11  ;;  %v164_v21 = vpack.c.bf16 %v161_v17, %v161_v17  ;;  %v2973_v22 = vld [vmem:[%s3731_s0] sm:$0xff]   ;;  %v3165_v25 = vld [vmem:[%s3729_s3 + $0x28] sm:$0xff]  ;;  %v3184_v30 = vld [vmem:[%s3729_s3 + $0x38] sm:$0xff] }
   0x7   :  { %2599 = vmatprep.subr.bf16.mxu1 %v3019_v3  ;;  %v3160_v24 = vld [vmem:[%s3729_s3 + $0x20] sm:$0xff]  ;;  %v250_v31 = vpack.c.bf16 %v3184_v30, %v3179_v29  ;;  %v2975_v32 = vld [vmem:[%s3730_s2 + $0x8] sm:$0xff]   ;;  %v3202_v34 = vld [vmem:[%s3731_s0 + $0x10] sm:$0xff]  }
   0x8   :  { %v189_v26 = vsel %vm100_vm2, %v164_v21, 0  ;;  %v2972_v27 = vld [vmem:[%s3730_s2] sm:$0xff]   ;;  %v249_v28 = vpack.c.bf16 %v3165_v25, %v3160_v24  ;;  %v3197_v33 = vld [vmem:[%s3731_s0 + $0x8] sm:$0xff]   ;;  %v2978_v35 = vld [vmem:[%s3730_s2 + $0x10] ss:$0 sps:$4 sm:$0xff]  }
   0x9   :  { %2592 = vmatpush3.bf16.msra.mxu0 %v102_v14  ;;  %v3217_v36 = vld [vmem:[%s3731_s0 + $0x18] sm:$0xff]   ;;  %v3222_v37 = vld [vmem:[%s3731_s0 + $0x20] sm:$0xff]   ;;  %v3233_v38 = vld [vmem:[%s3731_s0 + $0x28] sm:$0xff]  }
   0xa   :  { %2615 = vmatprep.subr.bf16.mxu0 %v247_v15  ;;  %2600 = vmatpush3.bf16.msra.mxu1 %v163_v18  ;;  %v3238_v39 = vld [vmem:[%s3731_s0 + $0x30] sm:$0xff]   ;;  %v3247_v40 = vld [vmem:[%s3731_s0 + $0x38] sm:$0xff]   ;;  %v3252_v41 = vld [vmem:[%s3731_s0 + $0x40] sm:$0xff]  }
   0xb   :  { %2601 = vmatprep.subr.bf16.mxu1 %v3019_v3  ;;  %v3261_v42 = vld [vmem:[%s3731_s0 + $0x48] sm:$0xff]   ;;  %v3266_v43 = vld [vmem:[%s3731_s0 + $0x50] sm:$0xff]   ;;  %v3275_v44 = vld [vmem:[%s3731_s0 + $0x58] sm:$0xff]  }
   0xc   :  { %2594 = vmatmul.mubr.msk.bf16.vlgmr.msra.gmra.mrb[0].mxu0 %vm93_vm0, %v2971_v20  ;;  %v828_v46 = vld [vmem:[%s3732_s6] sm:$0xff] }
   0xd   :  { %2616 = vmatpush3.bf16.msra.mxu0 %v247_v15  ;;  %2623 = vmatprep.mubr.msk.bf16.mxu0 %vm311_vm3, %v2973_v22  ;;  %v837_v47 = vld [vmem:[%s3733_s7] sm:$0xff] }
   0xe   :  { %2617 = vmatprep.subr.bf16.mxu0 %v248_v23  ;;  %2602 = vmatpush3.bf16.msra.mxu1 %v189_v26  ;;  %v844_v48 = vld [vmem:[%s3734_s8] sm:$0xff] }
   0xf   :  { %832 = vperm.xlu0 %2968, %v828_v46   ;;  %839 = vperm.xlu1 %2969, %v837_v47   ;;  %v851_v49 = vld [vmem:[%s3735_s9] sm:$0xff] }
  0x11   :  { %2618 = vmatpush3.bf16.msra.mxu0 %v248_v23  ;;  %2604 = vmatmul.mubr.msk.bf16.vlgmr.msra.gmra.mrb[0].mxu1 %vm178_vm4, %v2972_v27 }
  0x12   :  { %2619 = vmatprep.subr.bf16.mxu0 %v249_v28  ;;  %2607 = vmatprep.mubr.msk.bf16.mxu1 %vm3020_vm1, %v3019_v3 }
  0x13   :  { %846 = vperm.xlu0 %2968, %v844_v48   ;;  %853 = vperm.xlu1 %2969, %v851_v49  }
  0x15   :  { %2620 = vmatpush3.bf16.msra.mxu0 %v249_v28 }
  0x16   :  { %2621 = vmatprep.subr.bf16.mxu0 %v250_v31 }
  0x19   :  { %2622 = vmatpush3.bf16.msra.mxu0 %v250_v31  ;;  %2608 = vmatmul.mubr.msk.bf16.gmra.mrb[4].mxu1 %vm178_vm4, %v2975_v32 }
  0x1a   :  { %2611 = vmatprep.mubr.msk.bf16.mxu1 %vm3020_vm1, %v3019_v3 }
  0x1c   :  { %2624 = vmatmul.mubr.msk.bf16.vlgmr.msra.gmra.mrb[4].mxu0 %vm311_vm3, %v3197_v33 }
  0x1d   :  { %2627 = vmatprep.mubr.msk.bf16.mxu0 %vm311_vm3, %v3202_v34 }
  0x21   :  { %2612 = vmatmul.mubr.msk.bf16.gmra.mrb[8].mxu1 %vm178_vm4, %v2978_v35 }
  0x22   :  { %2655 = vmatprep.mubr.msk.bf16.mxu1 %vm311_vm3, %v2973_v22 }
  0x24   :  { %2628 = vmatmul.mubr.msk.bf16.gmra.mrb[8].mxu0 %vm311_vm3, %v3217_v36 }
  0x25   :  { %2631 = vmatprep.mubr.msk.bf16.mxu0 %vm311_vm3, %v3222_v37 }
  0x2c   :  { %2632 = vmatmul.mubr.msk.bf16.gmra.mrb[12].mxu0 %vm311_vm3, %v3233_v38 }
  0x2d   :  { %2635 = vmatprep.mubr.msk.bf16.mxu0 %vm311_vm3, %v3238_v39 }
  0x34   :  { %2636 = vmatmul.mubr.msk.bf16.gmra.mrb[16].mxu0 %vm311_vm3, %v3247_v40 }
  0x35   :  { %2639 = vmatprep.mubr.msk.bf16.mxu0 %vm311_vm3, %v3252_v41 }
  0x3c   :  { %2640 = vmatmul.mubr.msk.bf16.gmra.mrb[20].mxu0 %vm311_vm3, %v3261_v42 }
  0x3d   :  { %2643 = vmatprep.mubr.msk.bf16.mxu0 %vm311_vm3, %v3266_v43 }
  0x44   :  { %2644 = vmatmul.mubr.msk.bf16.gmra.mrb[24].mxu0 %vm311_vm3, %v3275_v44 }
  0x45   :  { %2701 = vmatprep.mubr.msk.f32.mxu0 %vm3020_vm1, %v3019_v3 }
  0xdf   :  { %v3293_v50 = vpop.f32.mrb[0].mxu0 }
  0xe0   :  { %v3295_v51 = vpop.f32.mrb[1].mxu0 }
  0xe1   :  { %v2596_v52 = vpop.f32.mrb[2].mxu0 }
  0xe2   :  { %v3297_v53 = vpop.f32.mrb[3].mxu0 }
  0xe4   :  { %v3299_v54 = vpop.f32.mrb[0].mxu1 }
  0xe5   :  { %v2605_v55 = vpop.f32.mrb[1].mxu1 }
  0xe6   :  { %v3301_v56 = vpop.f32.mrb[2].mxu1 }
  0xe7   :  { %v2606_v57 = vpop.f32.mrb[3].mxu1 }
  0xec   :  { %v3303_v58 = vpop.f32.mrb[4].mxu1 }
  0xed   :  { %v2609_v59 = vpop.f32.mrb[5].mxu1 }
  0xee   :  { %v3305_v61 = vpop.f32.mrb[6].mxu1 }
  0xef   :  { %v2625_v60 = vpop.f32.mrb[4].mxu0  ;;  %v2610_v0 = vpop.f32.mrb[7].mxu1 }
  0xf0   :  { %v479_v62 = vadd.f32 %v2625_v60, %v3293_v50  ;;  %v382_v63 = vpop.f32.mrb[5].mxu0 }
  0xf1   :  { %v477_v1 = vadd.f32 %v382_v63, %v3295_v51  ;;  %v2626_v2 = vpop.f32.mrb[6].mxu0 }
  0xf2   :  { %v480_v4 = vadd.f32 %v2626_v2, %v3299_v54  ;;  %v385_v5 = vpop.f32.mrb[7].mxu0  ;;  %v3311_v7 = vmul.f32 0.5, %v479_v62 }
  0xf3   :  { %v478_v6 = vadd.f32 %v385_v5, %v3297_v53  ;;  %v3315_v11 = vmul.f32 0.5, %v477_v1 }
  0xf4   :  { %v3313_v8 = vmul.f32 0.5, %v480_v4  ;;  %v3319_v13 = vpop.f32.mrb[8].mxu1 }
  0xf5   :  { %v3317_v12 = vmul.f32 0.5, %v478_v6  ;;  %v2613_v15 = vpop.f32.mrb[9].mxu1 }
  0xf6   :  { %v550_v14 = vpack.c.bf16 %v3313_v8, %v3311_v7  ;;  %v244_v20 = vpop.f32.mrb[10].mxu1 }
  0xf7   :  { %v549_v17 = vpack.c.bf16 %v3317_v12, %v3315_v11  ;;  %v2629_v18 = vpop.f32.mrb[8].mxu0  ;;  %v2614_v23 = vpop.f32.mrb[11].mxu1 }
  0xf8   :  { %v483_v21 = vadd.f32 %v2629_v18, %v3305_v61  ;;  %v398_v22 = vpop.f32.mrb[9].mxu0 }
  0xf9   :  { %v481_v26 = vadd.f32 %v398_v22, %v3301_v56  ;;  %v2630_v27 = vpop.f32.mrb[10].mxu0  ;;  %2647 = vmatprep.subr.bf16.mxu1 %v549_v17 }
  0xfa   :  { %v484_v28 = vadd.f32 %v2630_v27, %v3319_v13  ;;  %v401_v31 = vpop.f32.mrb[11].mxu0  ;;  %2648 = vmatpush3.bf16.msra.mxu1 %v549_v17  ;;  %v3329_v35 = vmul.f32 0.5, %v483_v21 }
  0xfb   :  { %v482_v32 = vadd.f32 %v401_v31, %v3303_v58  ;;  %2649 = vmatprep.subr.bf16.mxu1 %v550_v14  ;;  %v3333_v46 = vmul.f32 0.5, %v481_v26 }
  0xfc   :  { %v3331_v45 = vmul.f32 0.5, %v484_v28 }
  0xfd   :  { %v3335_v47 = vmul.f32 0.5, %v482_v32 }
  0xfe   :  { %v552_v48 = vpack.c.bf16 %v3331_v45, %v3329_v35  ;;  %2650 = vmatpush3.bf16.msra.mxu1 %v550_v14 }
  0xff   :  { %v551_v49 = vpack.c.bf16 %v3335_v47, %v3333_v46  ;;  %v2633_v52 = vpop.f32.mrb[12].mxu0 }
 0x100   :  { %v503_v55 = vadd.f32 %v2633_v52, %v3293_v50  ;;  %v414_v57 = vpop.f32.mrb[13].mxu0 }
 0x101   :  { %v501_v59 = vadd.f32 %v414_v57, %v3295_v51  ;;  %v2634_v60 = vpop.f32.mrb[14].mxu0  ;;  %2651 = vmatprep.subr.bf16.mxu1 %v551_v49 }
 0x102   :  { %v504_v62 = vadd.f32 %v2634_v60, %v3299_v54  ;;  %v417_v63 = vpop.f32.mrb[15].mxu0  ;;  %2652 = vmatpush3.bf16.msra.mxu1 %v551_v49  ;;  %v3345_v1 = vmul.f32 0.5, %v503_v55 }
 0x103   :  { %v502_v0 = vadd.f32 %v417_v63, %v3297_v53  ;;  %2653 = vmatprep.subr.bf16.mxu1 %v552_v48  ;;  %v3349_v4 = vmul.f32 0.5, %v501_v59 }
 0x104   :  { %v3347_v2 = vmul.f32 0.5, %v504_v62 }
 0x105   :  { %v3351_v5 = vmul.f32 0.5, %v502_v0 }
 0x106   :  { %v635_v6 = vpack.c.bf16 %v3347_v2, %v3345_v1  ;;  %2654 = vmatpush3.bf16.msra.mxu1 %v552_v48 }
 0x107   :  { %v634_v14 = vpack.c.bf16 %v3351_v5, %v3349_v4  ;;  %v2637_v15 = vpop.f32.mrb[16].mxu0 }
 0x108   :  { %v507_v17 = vadd.f32 %v2637_v15, %v3305_v61  ;;  %v430_v18 = vpop.f32.mrb[17].mxu0 }
 0x109   :  { %v505_v20 = vadd.f32 %v430_v18, %v3301_v56  ;;  %v2638_v21 = vpop.f32.mrb[18].mxu0  ;;  %2656 = vmatmul.mubr.msk.bf16.vlgmr.msra.gmra.mrb[12].mxu1 %vm311_vm3, %v3197_v33  ;;  %2663 = vmatprep.subr.bf16.mxu1 %v634_v14 }
 0x10a   :  { %v508_v22 = vadd.f32 %v2638_v21, %v3319_v13  ;;  %v433_v23 = vpop.f32.mrb[19].mxu0  ;;  %2664 = vmatpush3.bf16.msra.mxu1 %v634_v14  ;;  %2659 = vmatprep.mubr.msk.bf16.mxu1 %vm311_vm3, %v3202_v34  ;;  %v3365_v27 = vmul.f32 0.5, %v507_v17 }
 0x10b   :  { %v506_v26 = vadd.f32 %v433_v23, %v3303_v58  ;;  %2665 = vmatprep.subr.bf16.mxu1 %v635_v6  ;;  %v3369_v31 = vmul.f32 0.5, %v505_v20 }
 0x10c   :  { %v3367_v28 = vmul.f32 0.5, %v508_v22 }
 0x10d   :  { %v3371_v32 = vmul.f32 0.5, %v506_v26 }
 0x10e   :  { %v637_v33 = vpack.c.bf16 %v3367_v28, %v3365_v27  ;;  %2666 = vmatpush3.bf16.msra.mxu1 %v635_v6 }
 0x10f   :  { %v636_v48 = vpack.c.bf16 %v3371_v32, %v3369_v31  ;;  %v2641_v49 = vpop.f32.mrb[20].mxu0 }
 0x110   :  { %v527_v34 = vadd.f32 %v2641_v49, %v3293_v50  ;;  %v446_v52 = vpop.f32.mrb[21].mxu0 }
 0x111   :  { %v525_v55 = vadd.f32 %v446_v52, %v3295_v51  ;;  %v2642_v57 = vpop.f32.mrb[22].mxu0  ;;  %2660 = vmatmul.mubr.msk.bf16.gmra.mrb[16].mxu1 %vm311_vm3, %v3217_v36  ;;  %2667 = vmatprep.subr.bf16.mxu1 %v636_v48 }
 0x112   :  { %v528_v59 = vadd.f32 %v2642_v57, %v3299_v54  ;;  %v449_v60 = vpop.f32.mrb[23].mxu0  ;;  %2668 = vmatpush3.bf16.msra.mxu1 %v636_v48  ;;  %2671 = vmatprep.mubr.msk.bf16.mxu1 %vm311_vm3, %v3222_v37  ;;  %v3385_v63 = vmul.f32 0.5, %v527_v34 }
 0x113   :  { %v526_v62 = vadd.f32 %v449_v60, %v3297_v53  ;;  %2669 = vmatprep.subr.bf16.mxu1 %v637_v33  ;;  %v3389_v6 = vmul.f32 0.5, %v525_v55 }
 0x114   :  { %v3387_v0 = vmul.f32 0.5, %v528_v59 }
 0x115   :  { %v3391_v14 = vmul.f32 0.5, %v526_v62  ;;  %v493_v62 = vadd.f32 %v3315_v11, %v3117_v9 }
 0x116   :  { %v720_v36 = vpack.c.bf16 %v3387_v0, %v3385_v63  ;;  %2670 = vmatpush3.bf16.msra.mxu1 %v637_v33 }
 0x117   :  { %v719_v15 = vpack.c.bf16 %v3391_v14, %v3389_v6  ;;  %v2645_v17 = vpop.f32.mrb[24].mxu0 }
 0x118   :  { %v531_v37 = vadd.f32 %v2645_v17, %v3305_v61  ;;  %v462_v18 = vpop.f32.mrb[25].mxu0  ;;  %v496_v17 = vadd.f32 %v3313_v8, %v3146_v19 }
 0x119   :  { %v529_v20 = vadd.f32 %v462_v18, %v3301_v56  ;;  %v2646_v21 = vpop.f32.mrb[26].mxu0  ;;  %2672 = vmatmul.mubr.msk.bf16.vlgmr.msra.gmra.mrb[20].mxu1 %vm311_vm3, %v3233_v38  ;;  %2679 = vmatprep.subr.bf16.mxu1 %v719_v15 }
 0x11a   :  { %v532_v22 = vadd.f32 %v2646_v21, %v3319_v13  ;;  %v465_v23 = vpop.f32.mrb[27].mxu0  ;;  %2680 = vmatpush3.bf16.msra.mxu1 %v719_v15  ;;  %2675 = vmatprep.mubr.msk.bf16.mxu1 %vm311_vm3, %v3238_v39  ;;  %v3405_v33 = vmul.f32 0.5, %v531_v37  ;;  %v3022_v39 = vmov 0.0|0.0   ;;  %v494_v21 = vadd.f32 %v3317_v12, %v3122_v10 }
 0x11b   :  { %v530_v26 = vadd.f32 %v465_v23, %v3303_v58  ;;  %2681 = vmatprep.subr.bf16.mxu1 %v720_v36  ;;  %v3409_v49 = vmul.f32 0.5, %v529_v20  ;;  %2864 = vmatprep.subr.bf16.mxu0 %v3022_v39  ;;  %v829_v20 = vlaneseq }
 0x11c   :  { %v3407_v48 = vmul.f32 0.5, %v532_v22 }
 0x11d   :  { %v3411_v34 = vmul.f32 0.5, %v530_v26 }
 0x11e   :  { %v722_v38 = vpack.c.bf16 %v3407_v48, %v3405_v33  ;;  %2682 = vmatpush3.bf16.msra.mxu1 %v720_v36 }
 0x11f   :  { %v721_v52 = vpack.c.bf16 %v3411_v34, %v3409_v49 }
 0x121   :  { %2676 = vmatmul.mubr.msk.bf16.gmra.mrb[24].mxu1 %vm311_vm3, %v3247_v40  ;;  %2683 = vmatprep.subr.bf16.mxu1 %v721_v52 }
 0x122   :  { %2684 = vmatpush3.bf16.msra.mxu1 %v721_v52  ;;  %2687 = vmatprep.mubr.msk.bf16.mxu1 %vm311_vm3, %v3252_v41 }
 0x123   :  { %2685 = vmatprep.subr.bf16.mxu1 %v722_v38 }
 0x126   :  { %2686 = vmatpush3.bf16.msra.mxu1 %v722_v38 }
 0x127   :  { %2873 = vmatprep.subr.bf16.mxu1 %v3022_v39 }
 0x129   :  { %2688 = vmatmul.mubr.msk.bf16.vlgmr.msra.gmra.mrb[28].mxu1 %vm311_vm3, %v3261_v42 }
 0x12a   :  { %2691 = vmatprep.mubr.msk.bf16.mxu1 %vm311_vm3, %v3266_v43  ;;  %v495_v43 = vadd.f32 %v3311_v7, %v3138_v16 }
 0x131   :  { %2692 = vmatmul.mubr.msk.bf16.gmra.mrb[32].mxu1 %vm311_vm3, %v3275_v44 }
 0x132   :  { %2727 = vmatprep.mubr.msk.f32.mxu1 %vm3020_vm1, %v3019_v3 }
 0x1dc   :  { %v2657_v40 = vpop.f32.mrb[12].mxu1 }
 0x1dd   :  { %v596_v41 = vadd.f32 %v2657_v40, %v3293_v50  ;;  %v587_v55 = vpop.f32.mrb[13].mxu1  ;;  %v3444_v40 = vand.u32 127, %v829_v20 }
 0x1de   :  { %v588_v42 = vadd.f32 %v587_v55, %v3295_v51  ;;  %v2658_v57 = vpop.f32.mrb[14].mxu1 }
 0x1df   :  { %v620_v59 = vmul.f32 0.5, %v596_v41  ;;  %v599_v44 = vadd.f32 %v2658_v57, %v3299_v54  ;;  %v590_v60 = vpop.f32.mrb[15].mxu1  ;;  %v833_v57 = vpop.permute.xlu0 %832  ;;  %vm2377_vm12 = vcmp.eq.s32.totalorder %v3444_v40, 0  ;;  %vm2380_vm13 = vcmp.eq.s32.totalorder %v3444_v40, 1 }
 0x1e0   :  { %v618_v36 = vmul.f32 0.5, %v588_v42  ;;  %v591_v15 = vadd.f32 %v590_v60, %v3297_v53  ;;  %v497_v60 = vadd.f32 %v3333_v46, %v3160_v24  ;;  %vm834_vm5 = vcmp.eq.s32.totalorder %v3444_v40, %v833_v57 }
 0x1e1   :  { %v628_v37 = vadd.f32 %v620_v59, %v495_v43  ;;  %v621_v18 = vmul.f32 0.5, %v599_v44  ;;  %v499_v43 = vadd.f32 %v3329_v35, %v3179_v29  ;;  %v498_v35 = vadd.f32 %v3335_v47, %v3165_v25 }
 0x1e2   :  { %v626_v7 = vadd.f32 %v618_v36, %v493_v62  ;;  %v619_v22 = vmul.f32 0.5, %v591_v15  ;;  %vm2384_vm14 = vcmp.eq.s32.totalorder %v3444_v40, 2  ;;  %vm2388_vm15 = vcmp.eq.s32.totalorder %v3444_v40, 3 }
 0x1e3   :  { %v629_v23 = vadd.f32 %v621_v18, %v496_v17  ;;  %v500_v17 = vadd.f32 %v3331_v45, %v3184_v30  ;;  %v3460_v45 = vsel %vm834_vm5, 1.0, %v3019_v3 }
 0x1e4   :  { %v627_v26 = vadd.f32 %v619_v22, %v494_v21  ;;  %v2661_v38 = vpop.f32.mrb[16].mxu1  ;;  %v804_v41 = vmul.f32 0.33333334, %v626_v7  ;;  %v806_v22 = vmul.f32 0.33333334, %v628_v37  ;;  %v519_v37 = vadd.f32 %v3345_v1, %v3138_v16 }
 0x1e5   :  { %v612_v52 = vadd.f32 %v2661_v38, %v3305_v61  ;;  %v603_v11 = vpop.f32.mrb[17].mxu1  ;;  %v807_v46 = vmul.f32 0.33333334, %v629_v23  ;;  %v520_v1 = vadd.f32 %v3347_v2, %v3146_v19 }
 0x1e6   :  { %v805_v55 = vmul.f32 0.33333334, %v627_v26  ;;  %v604_v8 = vadd.f32 %v603_v11, %v3301_v56  ;;  %v2662_v42 = vpop.f32.mrb[18].mxu1 }
 0x1e7   :  { %v624_v12 = vmul.f32 0.5, %v612_v52  ;;  %v615_v59 = vadd.f32 %v2662_v42, %v3319_v13  ;;  %v606_v44 = vpop.f32.mrb[19].mxu1 }
 0x1e8   :  { %v2865_v62 = vpack.c.bf16 %v805_v55, %v804_v41  ;;  %v622_v36 = vmul.f32 0.5, %v604_v8  ;;  %v607_v15 = vadd.f32 %v606_v44, %v3303_v58  ;;  %v517_v44 = vadd.f32 %v3349_v4, %v3117_v9 }
 0x1e9   :  { %v632_v18 = vadd.f32 %v624_v12, %v499_v43  ;;  %v625_v20 = vmul.f32 0.5, %v615_v59 }
 0x1ea   :  { %v630_v21 = vadd.f32 %v622_v36, %v497_v60  ;;  %v623_v7 = vmul.f32 0.5, %v607_v15  ;;  %2866 = vmatpush3.bf16.msra.mxu0 %v2865_v62  ;;  %v840_v15 = vpop.permute.xlu1 %839 }
 0x1eb   :  { %v633_v26 = vadd.f32 %v625_v20, %v500_v17  ;;  %2699 = vmatprep.subr.mxu0 %v3019_v3  ;;  %v810_v8 = vmul.f32 0.33333334, %v632_v18  ;;  %v518_v20 = vadd.f32 %v3351_v5, %v3122_v10  ;;  %vm841_vm6 = vcmp.eq.s32.totalorder %v3444_v40, %v840_v15 }
 0x1ec   :  { %v808_v38 = vmul.f32 0.33333334, %v630_v21  ;;  %v631_v52 = vadd.f32 %v623_v7, %v498_v35  ;;  %v2673_v11 = vpop.f32.mrb[20].mxu1  ;;  %v847_v21 = vpop.permute.xlu0 %846 }
 0x1ed   :  { %v681_v41 = vadd.f32 %v2673_v11, %v3293_v50  ;;  %v672_v55 = vpop.f32.mrb[21].mxu1  ;;  %vm848_vm7 = vcmp.eq.s32.totalorder %v3444_v40, %v847_v21 }
 0x1ee   :  { %v2868_v42 = vpack.c.bf16 %v808_v38, %v807_v46  ;;  %v809_v47 = vmul.f32 0.33333334, %v631_v52  ;;  %v673_v57 = vadd.f32 %v672_v55, %v3295_v51  ;;  %v2674_v43 = vpop.f32.mrb[22].mxu1  ;;  %2700 = vmatpush3.msra.mxu0 %v806_v22  ;;  %v811_v46 = vmul.f32 0.33333334, %v633_v26 }
 0x1ef   :  { %v705_v23 = vmul.f32 0.5, %v681_v41  ;;  %v684_v12 = vadd.f32 %v2674_v43, %v3299_v54  ;;  %v675_v59 = vpop.f32.mrb[23].mxu1  ;;  %2867 = vmatprep.subr.bf16.mxu0 %v3022_v39  ;;  %2702 = vmatmul.mubr.msk.f32.vlgmr.msra.gmra.mrb[28].mxu0 %vm93_vm0, %v3460_v45  ;;  %v523_v26 = vadd.f32 %v3365_v27, %v3179_v29  ;;  %v521_v43 = vadd.f32 %v3369_v31, %v3160_v24 }
 0x1f0   :  { %v2871_v60 = vpack.c.bf16 %v810_v8, %v809_v47  ;;  %v703_v62 = vmul.f32 0.5, %v673_v57  ;;  %v676_v36 = vadd.f32 %v675_v59, %v3297_v53  ;;  %2869 = vmatpush3.bf16.msra.mxu0 %v2868_v42  ;;  %2875 = vmatpush3.bf16.msra.mxu1 %v2868_v42  ;;  %v3488_v8 = vsel %vm841_vm6, 1.0, %v3019_v3 }
 0x1f1   :  { %v713_v17 = vadd.f32 %v705_v23, %v519_v37  ;;  %v706_v18 = vmul.f32 0.5, %v684_v12  ;;  %2870 = vmatprep.subr.bf16.mxu0 %v3022_v39  ;;  %2876 = vmatprep.subr.bf16.mxu1 %v3022_v39  ;;  %v524_v59 = vadd.f32 %v3367_v28, %v3184_v30  ;;  %v3506_v27 = vsel %vm848_vm7, 1.0, %v3019_v3 }
 0x1f2   :  { %v711_v4 = vadd.f32 %v703_v62, %v517_v44  ;;  %v704_v35 = vmul.f32 0.5, %v676_v36  ;;  %2714 = vmatprep.mubr.msk.f32.mxu0 %vm3020_vm1, %v3019_v3  ;;  %v522_v31 = vadd.f32 %v3371_v32, %v3165_v25 }
 0x1f3   :  { %v714_v7 = vadd.f32 %v706_v18, %v520_v1  ;;  %v3513_v28 = vmul.f32 0.33333334, %v713_v17 }
 0x1f4   :  { %v712_v22 = vadd.f32 %v704_v35, %v518_v20  ;;  %v2677_v2 = vpop.f32.mrb[24].mxu1  ;;  %2872 = vmatpush3.bf16.msra.mxu0 %v2871_v60  ;;  %2878 = vmatpush3.bf16.msra.mxu1 %v2871_v60  ;;  %v812_v5 = vmul.f32 0.33333334, %v711_v4 }
 0x1f5   :  { %v697_v38 = vadd.f32 %v2677_v2, %v3305_v61  ;;  %v688_v52 = vpop.f32.mrb[25].mxu1  ;;  %2712 = vmatprep.subr.mxu0 %v3019_v3  ;;  %2725 = vmatprep.subr.mxu1 %v3019_v3  ;;  %v815_v1 = vmul.f32 0.33333334, %v714_v7  ;;  %v543_v7 = vadd.f32 %v3385_v63, %v3138_v16  ;;  %v544_v16 = vadd.f32 %v3387_v0, %v3146_v19 }
 0x1f6   :  { %v813_v11 = vmul.f32 0.33333334, %v712_v22  ;;  %v689_v41 = vadd.f32 %v688_v52, %v3301_v56  ;;  %v2678_v55 = vpop.f32.mrb[26].mxu1 }
 0x1f7   :  { %v709_v42 = vmul.f32 0.5, %v697_v38  ;;  %v700_v47 = vadd.f32 %v2678_v55, %v3319_v13  ;;  %v691_v57 = vpop.f32.mrb[27].mxu1 }
 0x1f8   :  { %v3495_v37 = vpack.c.bf16 %v813_v11, %v812_v5  ;;  %v707_v23 = vmul.f32 0.5, %v689_v41  ;;  %v692_v12 = vadd.f32 %v691_v57, %v3303_v58  ;;  %2713 = vmatpush3.msra.mxu0 %v811_v46  ;;  %2726 = vmatpush3.msra.mxu1 %v811_v46  ;;  %v541_v5 = vadd.f32 %v3389_v6, %v3117_v9 }
 0x1f9   :  { %v717_v44 = vadd.f32 %v709_v42, %v523_v26  ;;  %v710_v60 = vmul.f32 0.5, %v700_v47  ;;  %2879 = vmatprep.subr.bf16.mxu0 %v3022_v39  ;;  %2715 = vmatmul.mubr.msk.f32.vlgmr.msra.gmra.mrb[30].mxu0 %vm178_vm4, %v3488_v8  ;;  %v542_v9 = vadd.f32 %v3391_v14, %v3122_v10 }
 0x1fa   :  { %v715_v62 = vadd.f32 %v707_v23, %v521_v43  ;;  %v708_v36 = vmul.f32 0.5, %v692_v12  ;;  %2881 = vmatpush3.bf16.msra.mxu0 %v3495_v37  ;;  %2736 = vmatprep.mubr.msk.f32.mxu0 %vm3020_vm1, %v3019_v3  ;;  %v547_v23 = vadd.f32 %v3405_v33, %v3179_v29 }
 0x1fb   :  { %v718_v15 = vadd.f32 %v710_v60, %v524_v59  ;;  %2734 = vmatprep.subr.mxu0 %v3019_v3  ;;  %2882 = vmatprep.subr.bf16.mxu1 %v3022_v39  ;;  %v818_v17 = vmul.f32 0.33333334, %v717_v44 }
 0x1fc   :  { %v816_v18 = vmul.f32 0.33333334, %v715_v62  ;;  %v716_v20 = vadd.f32 %v708_v36, %v522_v31  ;;  %v2689_v4 = vpop.f32.mrb[28].mxu1  ;;  %2728 = vmatmul.mubr.msk.f32.vlgmr.msra.gmra.mrb[36].mxu1 %vm178_vm4, %v3506_v27 }
 0x1fd   :  { %v766_v32 = vadd.f32 %v2689_v4, %v3293_v50  ;;  %v757_v35 = vpop.f32.mrb[29].mxu1  ;;  %2749 = vmatprep.mubr.msk.f32.mxu1 %vm3020_vm1, %v3019_v3  ;;  %v3549_v19 = vmul.f32 0.33333334, %v718_v15 }
 0x1fe   :  { %v3522_v21 = vpack.c.bf16 %v816_v18, %v815_v1  ;;  %v817_v22 = vmul.f32 0.33333334, %v716_v20  ;;  %v758_v2 = vadd.f32 %v757_v35, %v3295_v51  ;;  %v2690_v46 = vpop.f32.mrb[30].mxu1  ;;  %2735 = vmatpush3.msra.mxu0 %v3513_v28  ;;  %v854_v20 = vpop.permute.xlu1 %853 }
 0x1ff   :  { %v790_v38 = vmul.f32 0.5, %v766_v32  ;;  %v769_v52 = vadd.f32 %v2690_v46, %v3299_v54  ;;  %v760_v50 = vpop.f32.mrb[31].mxu1  ;;  %2888 = vmatprep.subr.bf16.mxu0 %v3022_v39  ;;  %2737 = vmatmul.mubr.msk.f32.vlgmr.msra.gmra.mrb[32].mxu0 %vm93_vm0, %v3460_v45  ;;  %vm855_vm8 = vcmp.eq.s32.totalorder %v3444_v40, %v854_v20 }
 0x200   :  { %v3534_v11 = vpack.c.bf16 %v818_v17, %v817_v22  ;;  %v788_v51 = vmul.f32 0.5, %v758_v2  ;;  %v761_v41 = vadd.f32 %v760_v50, %v3297_v53  ;;  %2884 = vmatpush3.bf16.msra.mxu1 %v3522_v21  ;;  %2890 = vmatpush3.bf16.msra.mxu0 %v3522_v21 }
 0x201   :  { %v798_v54 = vadd.f32 %v790_v38, %v543_v7  ;;  %v791_v63 = vmul.f32 0.5, %v769_v52  ;;  %2885 = vmatprep.subr.bf16.mxu1 %v3022_v39  ;;  %2891 = vmatprep.subr.bf16.mxu0 %v3022_v39 }
 0x202   :  { %v796_v6 = vadd.f32 %v788_v51, %v541_v5  ;;  %v789_v55 = vmul.f32 0.5, %v761_v41  ;;  %2762 = vmatprep.mubr.msk.f32.mxu0 %vm3020_vm1, %v3019_v3 }
 0x203   :  { %v799_v53 = vadd.f32 %v791_v63, %v544_v16 }
 0x204   :  { %v797_v26 = vadd.f32 %v789_v55, %v542_v9  ;;  %v2693_v42 = vpop.f32.mrb[32].mxu1  ;;  %2887 = vmatpush3.bf16.msra.mxu1 %v3534_v11  ;;  %2893 = vmatpush3.bf16.msra.mxu0 %v3534_v11  ;;  %v820_v10 = vmul.f32 0.33333334, %v796_v6 }
 0x205   :  { %v782_v0 = vadd.f32 %v2693_v42, %v3305_v61  ;;  %v773_v47 = vpop.f32.mrb[33].mxu1  ;;  %2747 = vmatprep.subr.mxu1 %v3019_v3  ;;  %2760 = vmatprep.subr.mxu0 %v3019_v3  ;;  %v545_v61 = vadd.f32 %v3409_v49, %v3160_v24  ;;  %v546_v24 = vadd.f32 %v3411_v34, %v3165_v25 }
 0x206   :  { %v821_v14 = vmul.f32 0.33333334, %v797_v26  ;;  %v774_v57 = vadd.f32 %v773_v47, %v3301_v56  ;;  %v2694_v43 = vpop.f32.mrb[34].mxu1  ;;  %v548_v56 = vadd.f32 %v3407_v48, %v3184_v30  ;;  %v822_v30 = vmul.f32 0.33333334, %v798_v54 }
 0x207   :  { %v794_v12 = vmul.f32 0.5, %v782_v0  ;;  %v785_v59 = vadd.f32 %v2694_v43, %v3319_v13  ;;  %v776_v44 = vpop.f32.mrb[35].mxu1  ;;  %v823_v48 = vmul.f32 0.33333334, %v799_v53 }
 0x208   :  { %v2895_v60 = vpack.c.bf16 %v821_v14, %v820_v10  ;;  %v792_v31 = vmul.f32 0.5, %v774_v57  ;;  %v777_v62 = vadd.f32 %v776_v44, %v3303_v58  ;;  %2748 = vmatpush3.msra.mxu1 %v3549_v19  ;;  %2761 = vmatpush3.msra.mxu0 %v3549_v19  ;;  %v858_v57 = vld [vmem:[%s3736_s10] sm:$0xff] }
 0x209   :  { %v802_v36 = vadd.f32 %v794_v12, %v547_v23  ;;  %v795_v29 = vmul.f32 0.5, %v785_v59  ;;  %2894 = vmatprep.subr.bf16.mxu1 %v3022_v39  ;;  %2750 = vmatmul.mubr.msk.f32.vlgmr.msra.gmra.mrb[38].mxu1 %vm178_vm4, %v3488_v8 }
 0x20a   :  { %v800_v13 = vadd.f32 %v792_v31, %v545_v61  ;;  %v793_v33 = vmul.f32 0.5, %v777_v62  ;;  %2896 = vmatpush3.bf16.msra.mxu1 %v2895_v60  ;;  %2771 = vmatprep.mubr.msk.f32.mxu1 %vm3020_vm1, %v3019_v3 }
 0x20b   :  { %v803_v58 = vadd.f32 %v795_v29, %v548_v56  ;;  %2769 = vmatprep.subr.mxu1 %v3019_v3  ;;  %2897 = vmatprep.subr.bf16.mxu0 %v3022_v39  ;;  %v826_v25 = vmul.f32 0.33333334, %v802_v36 }
 0x20c   :  { %v824_v49 = vmul.f32 0.33333334, %v800_v13  ;;  %v801_v15 = vadd.f32 %v793_v33, %v546_v24  ;;  %2763 = vmatmul.mubr.msk.f32.vlgmr.msra.gmra.mrb[34].mxu0 %vm178_vm4, %v3506_v27 }
 0x20d   :  { %2784 = vmatprep.mubr.msk.f32.mxu0 %vm3020_vm1, %v3019_v3 }
 0x20e   :  { %v3578_v34 = vpack.c.bf16 %v824_v49, %v823_v48  ;;  %v825_v1 = vmul.f32 0.33333334, %v801_v15  ;;  %2770 = vmatpush3.msra.mxu1 %v822_v30 }
 0x20f   :  { %2903 = vmatprep.subr.bf16.mxu1 %v3022_v39  ;;  %2772 = vmatmul.mubr.msk.f32.vlgmr.msra.gmra.mrb[40].mxu1 %vm93_vm0, %v3460_v45  ;;  %v3595_v45 = vmul.f32 0.33333334, %v803_v58 }
 0x210   :  { %v3583_v18 = vpack.c.bf16 %v826_v25, %v825_v1  ;;  %2899 = vmatpush3.bf16.msra.mxu0 %v3578_v34  ;;  %2905 = vmatpush3.bf16.msra.mxu1 %v3578_v34 }
 0x211   :  { %2900 = vmatprep.subr.bf16.mxu0 %v3022_v39  ;;  %2906 = vmatprep.subr.bf16.mxu1 %v3022_v39 }
 0x212   :  { %2797 = vmatprep.mubr.msk.f32.mxu1 %vm3020_vm1, %v3019_v3 }
 0x214   :  { %2902 = vmatpush3.bf16.msra.mxu0 %v3583_v18  ;;  %2908 = vmatpush3.bf16.msra.mxu1 %v3583_v18 }
 0x215   :  { %2782 = vmatprep.subr.mxu0 %v3019_v3  ;;  %2795 = vmatprep.subr.mxu1 %v3019_v3 }
 0x218   :  { %2783 = vmatpush3.msra.mxu0 %v3595_v45  ;;  %2796 = vmatpush3.msra.mxu1 %v3595_v45 }
 0x219   :  { %2785 = vmatmul.mubr.msk.f32.vlgmr.msra.gmra.mrb[36].mxu0 %vm178_vm4, %v3488_v8  ;;  %2798 = vmatmul.mubr.msk.f32.vlgmr.msra.gmra.mrb[42].mxu1 %vm178_vm4, %v3506_v27  ;;  %v2446_v8 = vsel %vm855_vm8, 1.0, %v3019_v3 }
 0x21a   :  { %2909 = vmatprep.subr.bf16.mxu0 %v3022_v39  ;;  %2912 = vmatprep.subr.bf16.mxu1 %v3022_v39 }
 0x21b   :  { %2911 = vmatpush3.bf16.msra.mxu0 %v3495_v37  ;;  %2914 = vmatpush3.bf16.msra.mxu1 %v2895_v60 }
 0x21c   :  { %2804 = vmatprep.subr.mxu0 %v3019_v3  ;;  %2813 = vmatprep.subr.mxu1 %v3019_v3 }
 0x21d   :  { %2806 = vmatprep.mubr.msk.f32.mxu0 %vm3020_vm1, %v3019_v3  ;;  %2815 = vmatprep.mubr.msk.f32.mxu1 %vm3020_vm1, %v3019_v3 }
 0x21f   :  { %2805 = vmatpush3.msra.mxu0 %v3513_v28  ;;  %2814 = vmatpush3.msra.mxu1 %v822_v30 }
 0x220   :  { %2807 = vmatmul.mubr.msk.f32.vlgmr.msra.gmra.mrb[38].mxu0 %vm93_vm0, %v2446_v8  ;;  %2816 = vmatmul.mubr.msk.f32.vlgmr.msra.gmra.mrb[44].mxu1 %vm93_vm0, %v2446_v8 }
 0x221   :  { %2818 = vmatprep.subr.mxu0 %v3019_v3  ;;  %2820 = vmatprep.mubr.msk.f32.mxu0 %vm3020_vm1, %v3019_v3 }
 0x222   :  { %2823 = vmatprep.subr.mxu1 %v3019_v3  ;;  %2825 = vmatprep.mubr.msk.f32.mxu1 %vm3020_vm1, %v3019_v3 }
 0x2c2   :  { %v3623_v37 = vpop.f32.mrb[28].mxu0 }
 0x2c3   :  { %v2703_v27 = vpop.f32.mrb[29].mxu0 }
 0x2cc   :  { %v3625_v4 = vpop.f32.mrb[30].mxu0 }
 0x2cd   :  { %v2716_v28 = vpop.f32.mrb[31].mxu0  ;;  %v3629_v32 = vmul.f32 %v3625_v4, %v3623_v37 }
 0x2cf   :  { %v1080_v35 = vpop.f32.mrb[36].mxu1 }
 0x2d0   :  { %v2729_v17 = vpop.f32.mrb[37].mxu1  ;;  %v3632_v22 = vmul.f32 %v1080_v35, %v3623_v37  ;;  %v1136_v43 = vmul.f32 %v1080_v35, %v1080_v35 }
 0x2d2   :  { %v1218_v2 = vpop.f32.mrb[32].mxu0 }
 0x2d3   :  { %v2738_v46 = vpop.f32.mrb[33].mxu0  ;;  %v1392_v23 = vmul.f32 %v1218_v2, %v1218_v2 }
 0x2dc   :  { %v3634_v7 = vpop.f32.mrb[38].mxu1 }
 0x2dd   :  { %v2751_v38 = vpop.f32.mrb[39].mxu1  ;;  %v3637_v52 = vmul.f32 %v3634_v7, %v1218_v2 }
 0x2df   :  { %v1358_v50 = vpop.f32.mrb[34].mxu0 }
 0x2e0   :  { %v2764_v5 = vpop.f32.mrb[35].mxu0  ;;  %v1365_v51 = vmul.f32 %v1358_v50, %v1218_v2  ;;  %v1413_v12 = vmul.f32 %v1358_v50, %v1358_v50 }
 0x2e2   :  { %v1495_v41 = vpop.f32.mrb[40].mxu1 }
 0x2e3   :  { %v2773_v16 = vpop.f32.mrb[41].mxu1  ;;  %v1669_v59 = vmul.f32 %v1495_v41, %v1495_v41 }
 0x2ec   :  { %v3639_v54 = vpop.f32.mrb[36].mxu0  ;;  %v1635_v63 = vpop.f32.mrb[42].mxu1 }
 0x2ed   :  { %v2799_v9 = vpop.f32.mrb[43].mxu1  ;;  %v2786_v6 = vpop.f32.mrb[37].mxu0  ;;  %v3642_v55 = vmul.f32 %v3639_v54, %v1495_v41  ;;  %v3644_v53 = vmul.f32 %v1635_v63, %v1495_v41  ;;  %v1690_v44 = vmul.f32 %v1635_v63, %v1635_v63 }
 0x2f3   :  { %v1775_v26 = vpop.f32.mrb[38].mxu0  ;;  %v1845_v42 = vpop.f32.mrb[44].mxu1 }
 0x2f4   :  { %v1856_v0 = vmul.f32 %v1845_v42, %v1845_v42  ;;  %v1850_v47 = vmul.f32 %v1775_v26, %v1775_v26  ;;  %v2808_v10 = vpop.f32.mrb[39].mxu0  ;;  %v2817_v14 = vpop.f32.mrb[45].mxu1 }
 0x2f6   :  { %1857 = vadd.xlane.f32.xlu0 %v1856_v0  ;;  %1851 = vadd.xlane.f32.xlu1 %v1850_v47 }
 0x30c   :  { %860 = vperm.xlu0 %2968, %v858_v57  }
 0x32b   :  { %1366 = vadd.xlane.f32.xlu0 %v1365_v51 }
 0x32f   :  { %1137 = vadd.xlane.f32.xlu0 %v1136_v43 }
 0x333   :  { %1393 = vadd.xlane.f32.xlu0 %v1392_v23 }
 0x337   :  { %1414 = vadd.xlane.f32.xlu0 %v1413_v12 }
 0x33b   :  { %1670 = vadd.xlane.f32.xlu0 %v1669_v59 }
 0x33f   :  { %1691 = vadd.xlane.f32.xlu0 %v1690_v44 }
 0x383   :  { %v1858_v61 = vpop.xlane.xlu0 %1857  ;;  %v1852_v60 = vpop.xlane.xlu1 %1851 }
 0x384   :  { %v1859_v31 = vmax.f32 %v1858_v61, 1e-24  ;;  %v1853_v62 = vmax.f32 %v1852_v60, 1e-24 }
 0x386   :  { %2987 = vrsqrt.f32 %v1859_v31 }
 0x387   :  { %2989 = vrsqrt.f32 %v1853_v62 }
 0x38b   :  { %v861_v33 = vpop.permute.xlu0 %860 }
 0x38c   :  { %vm862_vm9 = vcmp.eq.s32.totalorder %v3444_v40, %v861_v33 }
 0x38d   :  { %v2447_v58 = vsel %vm862_vm9, 1.0, %v3019_v3 }
 0x390   :  { %v2988_v56 = vpop.eup %2987 }
 0x391   :  { %v2990_v36 = vpop.eup %2989  ;;  %v1861_v29 = vmul.f32 %v2988_v56, %v1845_v42 }
 0x392   :  { %v1855_v24 = vmul.f32 %v2990_v36, %v1775_v26  ;;  %v1115_v36 = vmul.f32 %v3623_v37, %v3623_v37 }
 0x393   :  { %2819 = vmatpush3.xpose.msra.mxu0 %v1861_v29 }
 0x394   :  { %2915 = vmatprep.subr.bf16.mxu0 %v3022_v39  ;;  %v1862_v13 = vmul.f32 %v1861_v29, %v1855_v24 }
 0x396   :  { %2821 = vmatmul.mubr.f32.vlgmr.msra.gmra.mrb[40].mxu0 %v1855_v24  ;;  %v1125_v24 = vmul.f32 %v3625_v4, %v3625_v4 }
 0x397   :  { %2917 = vmatpush3.bf16.msra.mxu0 %v3522_v21  ;;  %2838 = vmatprep.mubr.msk.f32.mxu0 %vm3020_vm1, %v3019_v3  ;;  %v3666_v21 = vld [vmem:[%s3737_s11] sm:$0xff] }
 0x398   :  { %2918 = vmatprep.subr.bf16.mxu0 %v3022_v39  ;;  %2824 = vmatpush3.msra.mxu1 %v3666_v21 }
 0x399   :  { %2921 = vmatprep.subr.bf16.mxu1 %v3022_v39 }
 0x39b   :  { %2920 = vmatpush3.bf16.msra.mxu0 %v3534_v11 }
 0x39c   :  { %2836 = vmatprep.subr.mxu0 %v3019_v3 }
 0x39f   :  { %2837 = vmatpush3.msra.mxu0 %v3549_v19 }
 0x3a0   :  { %2839 = vmatmul.mubr.msk.f32.vlgmr.msra.gmra.mrb[42].mxu0 %vm178_vm4, %v2447_v58  ;;  %2854 = vmatprep.subr.mxu0 %v3019_v3 }
 0x3a1   :  { %2856 = vmatprep.mubr.msk.f32.mxu0 %vm3020_vm1, %v3019_v3 }
 0x469   :  { %v1932_v11 = vpop.f32.mrb[40].mxu0 }
 0x46a   :  { %v1936_v30 = vmul.f32 5.0, %v1932_v11  ;;  %v2822_v48 = vpop.f32.mrb[41].mxu0 }
 0x46c   :  { %v1937_v19 = vmul.f32 1.442695, %v1936_v30 }
 0x46e   :  { %2991 = vpow2.f32 %v1937_v19 }
 0x473   :  { %v2111_v49 = vpop.f32.mrb[42].mxu0 }
 0x474   :  { %v2840_v15 = vpop.f32.mrb[43].mxu0 }
 0x475   :  { %v1402_v15 = vmul.f32 %v3634_v7, %v3634_v7  ;;  %v3708_v7 = vld [vmem:[%s3738_s12] sm:$0xff] }
 0x478   :  { %v2992_v25 = vpop.eup %2991 }
 0x479   :  { %2826 = vmatmul.mubr.msk.f32.vlgmr.msra.gmra.mrb[46].mxu1 %vm1939_vm10, %v2992_v25 }
 0x47a   :  { %2923 = vmatpush3.bf16.msra.mxu1 %v3578_v34  ;;  %2851 = vmatprep.mubr.msk.f32.mxu1 %vm3020_vm1, %v3019_v3 }
 0x47b   :  { %2924 = vmatprep.subr.bf16.mxu1 %v3022_v39  ;;  %v2186_v39 = vmul.f32 %v2111_v49, %v2111_v49 }
 0x47e   :  { %2926 = vmatpush3.bf16.msra.mxu1 %v3583_v18 }
 0x47f   :  { %2849 = vmatprep.subr.mxu1 %v3019_v3 }
 0x482   :  { %2850 = vmatpush3.msra.mxu1 %v3595_v45 }
 0x483   :  { %2852 = vmatmul.mubr.msk.f32.vlgmr.msra.gmra.mrb[48].mxu1 %vm178_vm4, %v2447_v58  ;;  %2859 = vmatprep.subr.mxu1 %v3019_v3 }
 0x484   :  { %2861 = vmatprep.mubr.msk.f32.mxu1 %vm3020_vm1, %v3019_v3  ;;  %v2028_v3 = vsel %vm1100_vm11, %v3666_v21, 0.0  ;;  %2860 = vmatpush3.msra.mxu1 %v3708_v7 }
 0x485   :  { %2029 = vadd.xlane.f32.xlu0 %v2028_v3 }
 0x54c   :  { %v3682_v1 = vpop.f32.mrb[46].mxu1 }
 0x54d   :  { %v2827_v34 = vpop.f32.mrb[47].mxu1 }
 0x556   :  { %v2181_v20 = vpop.f32.mrb[48].mxu1 }
 0x557   :  { %v2853_v8 = vpop.f32.mrb[49].mxu1  ;;  %v2192_v27 = vmul.f32 %v2181_v20, %v2181_v20 }
 0x558   :  { %v1679_v8 = vmul.f32 %v3639_v54, %v3639_v54 }
 0x559   :  { %2193 = vadd.xlane.f32.xlu1 %v2192_v27 }
 0x55d   :  { %2187 = vadd.xlane.f32.xlu1 %v2186_v39 }
 0x561   :  { %1085 = vadd.xlane.f32.xlu1 %v3629_v32 }
 0x565   :  { %1088 = vadd.xlane.f32.xlu1 %v3632_v22 }
 0x569   :  { %1363 = vadd.xlane.f32.xlu1 %v3637_v52  ;;  %v1367_v52 = vpop.xlane.xlu0 %1366 }
 0x56d   :  { %1640 = vadd.xlane.f32.xlu1 %v3642_v55  ;;  %v1138_v3 = vpop.xlane.xlu0 %1137 }
 0x571   :  { %1643 = vadd.xlane.f32.xlu1 %v3644_v53 }
 0x575   :  { %1863 = vadd.xlane.f32.xlu1 %v1862_v13 }
 0x5e6   :  { %v2194_v18 = vpop.xlane.xlu1 %2193 }
 0x5e7   :  { %v2195_v45 = vmax.f32 %v2194_v18, 1e-24  ;;  %v1394_v18 = vpop.xlane.xlu0 %1393 }
 0x5e9   :  { %2993 = vrsqrt.f32 %v2195_v45  ;;  %v1139_v45 = vrot.slane %v1138_v3, 4 }
 0x5ea   :  { %v2188_v28 = vpop.xlane.xlu1 %2187 }
 0x5eb   :  { %v2189_v35 = vmax.f32 %v2188_v28, 1e-24  ;;  %v1415_v54 = vpop.xlane.xlu0 %1414 }
 0x5ed   :  { %2995 = vrsqrt.f32 %v2189_v35 }
 0x5ee   :  { %v1086_v32 = vpop.xlane.xlu1 %1085 }
 0x5f2   :  { %v1089_v17 = vpop.xlane.xlu1 %1088 }
 0x5f3   :  { %v2994_v22 = vpop.eup %2993  ;;  %v1090_v2 = vsub.f32 %v1089_v17, %v1086_v32  ;;  %v1140_v32 = vadd.f32 %v1139_v45, %v1138_v3 }
 0x5f4   :  { %v2197_v46 = vmul.f32 %v2994_v22, %v2181_v20 }
 0x5f5   :  { %v1092_v38 = vand.u32 2147483647, %v1090_v2  ;;  %v1091_v61 = vmax.f32 %v1090_v2, 0.0 }
 0x5f6   :  { %2855 = vmatpush3.xpose.msra.mxu0 %v2197_v46  ;;  %v1364_v50 = vpop.xlane.xlu1 %1363 }
 0x5f7   :  { %v2996_v5 = vpop.eup %2995  ;;  %v1093_v51 = vsub.f32 0.0, %v1092_v38  ;;  %v1368_v41 = vsub.f32 %v1367_v52, %v1364_v50  ;;  %v1395_v50 = vrot.slane %v1394_v18, 4 }
 0x5f8   :  { %v2191_v16 = vmul.f32 %v2996_v5, %v2111_v49 }
 0x5f9   :  { %v1094_v63 = vmul.f32 1.442695, %v1093_v51  ;;  %v1370_v9 = vand.u32 2147483647, %v1368_v41  ;;  %v1369_v33 = vmax.f32 %v1368_v41, 0.0  ;;  %v1671_v51 = vpop.xlane.xlu0 %1670 }
 0x5fa   :  { %2857 = vmatmul.mubr.f32.vlgmr.msra.gmra.mrb[44].mxu0 %v2191_v16  ;;  %v1641_v6 = vpop.xlane.xlu1 %1640  ;;  %v2198_v55 = vmul.f32 %v2197_v46, %v2191_v16  ;;  %v1141_v46 = vrot.slane %v1140_v32, 2 }
 0x5fb   :  { %2997 = vpow2.f32 %v1094_v63  ;;  %v1371_v53 = vsub.f32 0.0, %v1370_v9 }
 0x5fd   :  { %v1372_v26 = vmul.f32 1.442695, %v1371_v53  ;;  %v1142_v53 = vadd.f32 %v1141_v46, %v1140_v32 }
 0x5fe   :  { %v1644_v42 = vpop.xlane.xlu1 %1643 }
 0x5ff   :  { %v1645_v0 = vsub.f32 %v1644_v42, %v1641_v6  ;;  %2999 = vpow2.f32 %v1372_v26  ;;  %v1396_v26 = vadd.f32 %v1395_v50, %v1394_v18  ;;  %v1416_v42 = vrot.slane %v1415_v54, 4 }
 0x601   :  { %v1647_v47 = vand.u32 2147483647, %v1645_v0  ;;  %v1646_v37 = vmax.f32 %v1645_v0, 0.0 }
 0x602   :  { %v1864_v19 = vpop.xlane.xlu1 %1863 }
 0x603   :  { %v1648_v10 = vsub.f32 0.0, %v1647_v47  ;;  %v1865_v25 = vmul.f32 5.0, %v1864_v19 }
 0x605   :  { %v2998_v14 = vpop.eup %2997  ;;  %v1649_v57 = vmul.f32 1.442695, %v1648_v10 }
 0x606   :  { %v1096_v43 = vadd.f32 1.0, %v2998_v14  ;;  %v1692_v14 = vpop.xlane.xlu0 %1691 }
 0x608   :  { %3001 = vlog2.f32 %v1096_v43 }
 0x609   :  { %3003 = vpow2.f32 %v1649_v57  ;;  %v3000_v23 = vpop.eup %2999 }
 0x60a   :  { %v1374_v12 = vadd.f32 1.0, %v3000_v23  ;;  %v1143_v23 = vrot.slane %v1142_v53, 1 }
 0x60c   :  { %3005 = vlog2.f32 %v1374_v12  ;;  %v1397_v12 = vrot.slane %v1396_v26, 2 }
 0x612   :  { %v3002_v59 = vpop.eup %3001 }
 0x613   :  { %v3004_v44 = vpop.eup %3003  ;;  %v1098_v60 = vmul.f32 0.6931472, %v3002_v59  ;;  %v1417_v59 = vadd.f32 %v1416_v42, %v1415_v54 }
 0x614   :  { %v1651_v62 = vadd.f32 1.0, %v3004_v44  ;;  %v1672_v44 = vrot.slane %v1671_v51, 4 }
 0x615   :  { %v1099_v31 = vadd.f32 %v1098_v60, %v1091_v61 }
 0x616   :  { %3007 = vlog2.f32 %v1651_v62  ;;  %v3006_v29 = vpop.eup %3005 }
 0x617   :  { %v1101_v56 = vsel %vm1100_vm11, %v1099_v31, 0.0  ;;  %v1376_v13 = vmul.f32 0.6931472, %v3006_v29  ;;  %3009 = vlog2.f32 %v3682_v1  ;;  %v2030_v29 = vpop.xlane.xlu0 %2029 }
 0x618   :  { %1102 = vadd.xlane.f32.xlu1 %v1101_v56  ;;  %v2031_v19 = vrot.slane %v2030_v29, 4 }
 0x619   :  { %v1377_v58 = vadd.f32 %v1376_v13, %v1369_v33  ;;  %v1673_v13 = vadd.f32 %v1672_v44, %v1671_v51  ;;  %v1693_v33 = vrot.slane %v1692_v14, 4 }
 0x61b   :  { %v1378_v30 = vsel %vm1100_vm11, %v1377_v58, 0.0 }
 0x61c   :  { %1116 = vadd.xlane.f32.xlu1 %v1115_v36  ;;  %v1144_v36 = vadd.f32 %v1143_v23, %v1142_v53 }
 0x620   :  { %1126 = vadd.xlane.f32.xlu1 %v1125_v24  ;;  %v3008_v11 = vpop.eup %3007  ;;  %v1418_v24 = vrot.slane %v1417_v59, 2 }
 0x621   :  { %v1653_v48 = vmul.f32 0.6931472, %v3008_v11  ;;  %v3010_v49 = vpop.eup %3009  ;;  %v1398_v11 = vadd.f32 %v1397_v12, %v1396_v26 }
 0x622   :  { %v2014_v34 = vmul.f32 0.6931472, %v3010_v49 }
 0x623   :  { %v1654_v4 = vadd.f32 %v1653_v48, %v1646_v37 }
 0x624   :  { %2199 = vadd.xlane.f32.xlu1 %v2198_v55  ;;  %v2015_v1 = vsub.f32 %v1865_v25, %v2014_v34  ;;  %v1694_v25 = vadd.f32 %v1693_v33, %v1692_v14  ;;  %v1399_v34 = vrot.slane %v1398_v11, 1 }
 0x625   :  { %v1655_v20 = vsel %vm1100_vm11, %v1654_v4, 0.0 }
 0x626   :  { %v2016_v27 = vmul.f32 %v2015_v1, %v3666_v21  ;;  %v1419_v1 = vadd.f32 %v1418_v24, %v1417_v59  ;;  %v1400_v32 = vadd.f32 %v1399_v34, %v1398_v11 }
 0x628   :  { %1379 = vadd.xlane.f32.xlu1 %v1378_v30  ;;  %v2017_v39 = vsel %vm1100_vm11, %v2016_v27, 0.0  ;;  %v1420_v54 = vrot.slane %v1419_v1, 1 }
 0x62a   :  { %v1421_v51 = vadd.f32 %v1420_v54, %v1419_v1 }
 0x62c   :  { %1403 = vadd.xlane.f32.xlu1 %v1402_v15  ;;  %v1674_v15 = vrot.slane %v1673_v13, 2 }
 0x630   :  { %1656 = vadd.xlane.f32.xlu1 %v1655_v20 }
 0x634   :  { %1680 = vadd.xlane.f32.xlu1 %v1679_v8 }
 0x638   :  { %2018 = vadd.xlane.f32.xlu1 %v2017_v39  ;;  %v2032_v39 = vadd.f32 %v2031_v19, %v2030_v29  ;;  %v2363_v19 = vsel %vm1100_vm11, %v3708_v7, 0.0 }
 0x639   :  { %2364 = vadd.xlane.f32.xlu0 %v2363_v19 }
 0x63a   :  { %v2033_v46 = vrot.slane %v2032_v39, 2 }
 0x6a5   :  { %v1103_v28 = vpop.xlane.xlu1 %1102 }
 0x6a6   :  { %v1104_v35 = vrot.slane %v1103_v28, 4 }
 0x6a8   :  { %v1105_v17 = vadd.f32 %v1104_v35, %v1103_v28  ;;  %v1695_v28 = vrot.slane %v1694_v25, 2 }
 0x6a9   :  { %v1117_v21 = vpop.xlane.xlu1 %1116 }
 0x6aa   :  { %v1106_v22 = vrot.slane %v1105_v17, 2  ;;  %v1118_v2 = vrot.slane %v1117_v21, 4 }
 0x6ac   :  { %v1119_v38 = vadd.f32 %v1118_v2, %v1117_v21  ;;  %v1107_v52 = vadd.f32 %v1106_v22, %v1105_v17  ;;  %v1675_v17 = vadd.f32 %v1674_v15, %v1673_v13 }
 0x6ad   :  { %v1127_v5 = vpop.xlane.xlu1 %1126 }
 0x6ae   :  { %v1120_v41 = vrot.slane %v1119_v38, 2  ;;  %v1128_v16 = vrot.slane %v1127_v5, 4  ;;  %v1108_v63 = vrot.slane %v1107_v52, 1 }
 0x6b0   :  { %v1129_v9 = vadd.f32 %v1128_v16, %v1127_v5  ;;  %v1109_v6 = vadd.f32 %v1108_v63, %v1107_v52  ;;  %v1121_v55 = vadd.f32 %v1120_v41, %v1119_v38  ;;  %v1676_v41 = vrot.slane %v1675_v17, 1 }
 0x6b1   :  { %v3711_v0 = vpop.xlane.xlu1 %2199  ;;  %v1696_v16 = vadd.f32 %v1695_v28, %v1694_v25 }
 0x6b2   :  { %v1130_v47 = vrot.slane %v1129_v9, 2  ;;  %2928 = vpush %v1109_v6  ;;  %v1122_v10 = vrot.slane %v1121_v55, 1  ;;  %v2201_v1 = vmul.f32 5.0, %v3711_v0 }
 0x6b4   :  { %v1123_v57 = vadd.f32 %v1122_v10, %v1121_v55  ;;  %v1131_v43 = vadd.f32 %v1130_v47, %v1129_v9  ;;  %v2034_v55 = vadd.f32 %v2033_v46, %v2032_v39  ;;  %v1677_v47 = vadd.f32 %v1676_v41, %v1675_v17 }
 0x6b5   :  { %v1380_v61 = vpop.xlane.xlu1 %1379  ;;  %v1697_v10 = vrot.slane %v1696_v16, 1 }
 0x6b6   :  { %v1381_v60 = vrot.slane %v1380_v61, 4  ;;  %2930 = vpush %v1123_v57  ;;  %v1132_v31 = vrot.slane %v1131_v43, 1 }
 0x6b7   :  { %v1698_v44 = vadd.f32 %v1697_v10, %v1696_v16 }
 0x6b8   :  { %v1382_v62 = vadd.f32 %v1381_v60, %v1380_v61  ;;  %v1133_v56 = vadd.f32 %v1132_v31, %v1131_v43  ;;  %v2035_v43 = vrot.slane %v2034_v55, 1 }
 0x6b9   :  { %v1404_v58 = vpop.xlane.xlu1 %1403 }
 0x6ba   :  { %v1383_v30 = vrot.slane %v1382_v62, 2  ;;  %v1405_v48 = vrot.slane %v1404_v58, 4  ;;  %2932 = vpush %v1133_v56 }
 0x6bb   :  { %2934 = vpush %v1144_v36 }
 0x6bc   :  { %v1406_v37 = vadd.f32 %v1405_v48, %v1404_v58  ;;  %v1384_v49 = vadd.f32 %v1383_v30, %v1382_v62  ;;  %v2036_v62 = vadd.f32 %v2035_v43, %v2034_v55 }
 0x6bd   :  { %v1657_v4 = vpop.xlane.xlu1 %1656 }
 0x6be   :  { %v1407_v20 = vrot.slane %v1406_v37, 2  ;;  %v1658_v8 = vrot.slane %v1657_v4, 4  ;;  %v1385_v27 = vrot.slane %v1384_v49, 1 }
 0x6c0   :  { %v1659_v3 = vadd.f32 %v1658_v8, %v1657_v4  ;;  %v1386_v18 = vadd.f32 %v1385_v27, %v1384_v49  ;;  %v1408_v45 = vadd.f32 %v1407_v20, %v1406_v37 }
 0x6c1   :  { %v1681_v35 = vpop.xlane.xlu1 %1680 }
 0x6c2   :  { %v1660_v21 = vrot.slane %v1659_v3, 2  ;;  %v1682_v22 = vrot.slane %v1681_v35, 4  ;;  %2936 = vpush %v1386_v18  ;;  %v1409_v2 = vrot.slane %v1408_v45, 1 }
 0x6c3   :  { %2938 = vpush %v1400_v32 }
 0x6c4   :  { %v1683_v38 = vadd.f32 %v1682_v22, %v1681_v35  ;;  %v1410_v52 = vadd.f32 %v1409_v2, %v1408_v45  ;;  %v1661_v50 = vadd.f32 %v1660_v21, %v1659_v3 }
 0x6c5   :  { %v2019_v5 = vpop.xlane.xlu1 %2018 }
 0x6c6   :  { %v1684_v63 = vrot.slane %v1683_v38, 2  ;;  %v2020_v9 = vrot.slane %v2019_v5, 4  ;;  %2940 = vpush %v1410_v52  ;;  %v1662_v6 = vrot.slane %v1661_v50, 1  ;;  %v2365_v3 = vpop.xlane.xlu0 %2364 }
 0x6c7   :  { %2942 = vpush %v1421_v51  ;;  %v2366_v18 = vrot.slane %v2365_v3, 4 }
 0x6c8   :  { %v2021_v53 = vadd.f32 %v2020_v9, %v2019_v5  ;;  %v1663_v26 = vadd.f32 %v1662_v6, %v1661_v50  ;;  %v1685_v42 = vadd.f32 %v1684_v63, %v1683_v38 }
 0x6c9   :  { %v2367_v45 = vadd.f32 %v2366_v18, %v2365_v3 }
 0x6ca   :  { %v2022_v14 = vrot.slane %v2021_v53, 2  ;;  %2944 = vpush %v1663_v26  ;;  %v1686_v57 = vrot.slane %v1685_v42, 1 }
 0x6cb   :  { %2946 = vpush %v1677_v47  ;;  %v2368_v28 = vrot.slane %v2367_v45, 2 }
 0x6cc   :  { %v1687_v23 = vadd.f32 %v1686_v57, %v1685_v42  ;;  %v2023_v12 = vadd.f32 %v2022_v14, %v2021_v53 }
 0x6cd   :  { %v2268_v59 = vpop.f32.mrb[44].mxu0  ;;  %v2369_v17 = vadd.f32 %v2368_v28, %v2367_v45 }
 0x6ce   :  { %v2272_v61 = vmul.f32 5.0, %v2268_v59  ;;  %2948 = vpush %v1687_v23  ;;  %v2858_v60 = vpop.f32.mrb[45].mxu0  ;;  %v2024_v31 = vrot.slane %v2023_v12, 1 }
 0x6cf   :  { %2950 = vpush %v1698_v44  ;;  %v2370_v2 = vrot.slane %v2369_v17, 1 }
 0x6d0   :  { %v2273_v56 = vmul.f32 1.442695, %v2272_v61  ;;  %v2025_v36 = vadd.f32 %v2024_v31, %v2023_v12 }
 0x6d1   :  { %v2371_v38 = vadd.f32 %v2370_v2, %v2369_v17 }
 0x6d2   :  { %3011 = vpow2.f32 %v2273_v56  ;;  %2952 = vpush %v2025_v36 }
 0x6d3   :  { %2954 = vpush %v2036_v62 }
 0x6dc   :  { %v3012_v29 = vpop.eup %3011 }
 0x6dd   :  { %2862 = vmatmul.mubr.msk.f32.vlgmr.msra.gmra.mrb[50].mxu1 %vm1939_vm10, %v3012_v29 }
 0x6e3   :  { %s2929_s12 = spop %2928 }
 0x6e4   :  { %s1113_s21 = smul.f32 0.125, %s2929_s12 }
 0x6e7   :  { %s2931_s5 = spop %2930 }
 0x6eb   :  { %s2933_s2 = spop %2932 }
 0x6ec   :  { %s1135_s19 = sadd.f32 %s2933_s2, %s2931_s5  ;;  %s2935_s1 = spop %2934 }
 0x6ee   :  { %s1146_s20 = sadd.f32 %s2935_s1, %s1135_s19 }
 0x6f0   :  { %s1147_s26 = smul.f32 0.5, %s1146_s20 }
 0x6f2   :  { %s1150_s3 = smul.f32 0.125, %s1147_s26 }
 0x6f3   :  { %s2937_s22 = spop %2936 }
 0x6f4   :  { %s1390_s23 = smul.f32 0.125, %s2937_s22  ;;  %s2939_s25 = spop %2938 }
 0x6f6   :  { %s1391_s24 = sadd.f32 %s1390_s23, %s1113_s21 }
 0x6f7   :  { %s2941_s27 = spop %2940 }
 0x6f8   :  { %s1412_s28 = sadd.f32 %s2941_s27, %s2939_s25  ;;  %s2943_s29 = spop %2942 }
 0x6fa   :  { %s1423_s30 = sadd.f32 %s2943_s29, %s1412_s28 }
 0x6fb   :  { %s2945_s14 = spop %2944 }
 0x6fc   :  { %s1424_s15 = smul.f32 0.5, %s1423_s30  ;;  %s2947_s17 = spop %2946 }
 0x6fd   :  { %s1667_s16 = smul.f32 0.125, %s2945_s14 }
 0x6fe   :  { %s1427_s0 = smul.f32 0.125, %s1424_s15 }
 0x6ff   :  { %s1668_s4 = sadd.f32 %s1667_s16, %s1391_s24  ;;  %s2949_s18 = spop %2948 }
 0x700   :  { %s1428_s6 = sadd.f32 %s1427_s0, %s1150_s3  ;;  %s2951_s8 = spop %2950 }
 0x701   :  { %s1689_s7 = sadd.f32 %s2949_s18, %s2947_s17  ;;  %v2378_v13 = vstv %s1668_s4 }
 0x702   :  { %v2379_v58 = vsel %vm2377_vm12, %v2378_v13, 0.0 }
 0x703   :  { %s1700_s9 = sadd.f32 %s2951_s8, %s1689_s7  ;;  %s2953_s10 = spop %2952 }
 0x704   :  { %s2955_s11 = spop %2954  ;;  %s2027_s19 = ssub.f32 0.0, %s2953_s10 }
 0x705   :  { %s1701_s12 = smul.f32 0.5, %s1700_s9  ;;  %v2038_v24 = vstv %s2955_s11 }
 0x706   :  { %3013 = vrcp.f32 %v2038_v24 }
 0x707   :  { %s1704_s5 = smul.f32 0.125, %s1701_s12 }
 0x709   :  { %s1705_s2 = sadd.f32 %s1704_s5, %s1428_s6 }
 0x70b   :  { %v2381_v33 = vstv %s1705_s2 }
 0x70c   :  { %v2382_v11 = vsel %vm2380_vm13, %v2381_v33, 0.0 }
 0x70d   :  { %v2383_v30 = vadd.f32 %v2382_v11, %v2379_v58 }
 0x710   :  { %v3014_v48 = vpop.eup %3013 }
 0x711   :  { %2956 = vpush %v3014_v48 }
 0x742   :  { %s2957_s1 = spop %2956 }
 0x743   :  { %s2041_s20 = smul.f32 %s2957_s1, %s2027_s19 }
 0x745   :  { %v2385_v37 = vstv %s2041_s20 }
 0x746   :  { %v2386_v49 = vsel %vm2384_vm14, %v2385_v37, 0.0 }
 0x747   :  { %v2387_v15 = vadd.f32 %v2386_v49, %v2383_v30 }
 0x7b0   :  { %v2344_v25 = vpop.f32.mrb[50].mxu1 }
 0x7b1   :  { %3015 = vlog2.f32 %v2344_v25  ;;  %v2863_v4 = vpop.f32.mrb[51].mxu1 }
 0x7bb   :  { %v3016_v34 = vpop.eup %3015 }
 0x7bc   :  { %v2349_v20 = vmul.f32 0.6931472, %v3016_v34 }
 0x7be   :  { %v2350_v8 = vsub.f32 %v2201_v1, %v2349_v20 }
 0x7c0   :  { %v2351_v27 = vmul.f32 %v2350_v8, %v3708_v7 }
 0x7c2   :  { %v2352_v39 = vsel %vm1100_vm11, %v2351_v27, 0.0 }
 0x7c3   :  { %2353 = vadd.xlane.f32.xlu1 %v2352_v39 }
 0x850   :  { %v2354_v35 = vpop.xlane.xlu1 %2353 }
 0x851   :  { %v2355_v32 = vrot.slane %v2354_v35, 4 }
 0x853   :  { %v2356_v54 = vadd.f32 %v2355_v32, %v2354_v35 }
 0x855   :  { %v2357_v21 = vrot.slane %v2356_v54, 2 }
 0x857   :  { %v2358_v22 = vadd.f32 %v2357_v21, %v2356_v54 }
 0x859   :  { %v2359_v46 = vrot.slane %v2358_v22, 1 }
 0x85b   :  { %v2360_v0 = vadd.f32 %v2359_v46, %v2358_v22 }
 0x85d   :  { %2958 = vpush %v2360_v0 }
 0x85e   :  { %2960 = vpush %v2371_v38 }
 0x88e   :  { %s2959_s21 = spop %2958 }
 0x88f   :  { %s2961_s22 = spop %2960  ;;  %s2362_s23 = ssub.f32 0.0, %s2959_s21 }
 0x890   :  { %v2373_v7 = vstv %s2961_s22 }
 0x891   :  { %3017 = vrcp.f32 %v2373_v7 }
 0x89b   :  { %v3018_v52 = vpop.eup %3017 }
 0x89c   :  { %2962 = vpush %v3018_v52 }
 0x8cd   :  { %s2963_s24 = spop %2962 }
 0x8ce   :  { %s2376_s25 = smul.f32 %s2963_s24, %s2362_s23 }
 0x8d0   :  { %v2389_v50 = vstv %s2376_s25 }
 0x8d1   :  { %v2390_v5 = vsel %vm2388_vm15, %v2389_v50, 0.0 }
 0x8d2   :  { %v2391_v51 = vadd.f32 %v2390_v5, %v2387_v15 }
 0x8d4   :  { %2392 = vst [vmem:[%s3739_s13] sm:$0x1] %v2391_v51 }

</bundles_post_ra>
